<compile_context>
chip_gen: v5e
topology: v5e:2x2
jax: 0.10.0
libtpu: 0.0.40
codegen_flags: <defaults>
</compile_context>

<pallas_src>
import functools

import jax
import jax.numpy as jnp
from jax.experimental import pallas as pl
from jax.experimental.pallas import tpu as pltpu

# ---- synthetic "bert-tiny" config (small shapes, same structure as BertModel) ----
VOCAB = 128
TYPE_VOCAB = 2
MAX_POS = 64
HIDDEN = 32
N_HEADS = 4
HEAD_DIM = HIDDEN // N_HEADS
N_LAYERS = 2
INTERMEDIATE = 64
NUM_CLASSES = 2
LANE = 128              # lane-dense padded classifier width (output sliced in wrapper)
LN_EPS = 1e-12
MASK_NEG = -10000.0     # classic HF BERT extended-attention-mask bias


# ----------------------------- in-kernel helpers --------------------------------
def _mm(a, w_bf16):
    """Activation (f32) x weight (already bf16) on the MXU with f32 accumulation."""
    return jnp.dot(a.astype(jnp.bfloat16), w_bf16, preferred_element_type=jnp.float32)


def _mm_nt_bf16(a_bf16, b_bf16):
    """a @ b.T, both operands already bf16, f32 accumulation."""
    return jax.lax.dot_general(
        a_bf16, b_bf16,
        dimension_numbers=(((1,), (1,)), ((), ())),
        preferred_element_type=jnp.float32)


def _layernorm(x, g, b):
    mu = jnp.mean(x, axis=-1, keepdims=True)
    var = jnp.mean(jnp.square(x - mu), axis=-1, keepdims=True)
    return (x - mu) * jax.lax.rsqrt(var + LN_EPS) * g + b


# ------------------------------ fused forward kernel ----------------------------
def _nel_kernel(h_ref, mb_ref,
                wqkv_ref, bqkv_ref, wo_ref, bo_ref, ln1g_ref, ln1b_ref,
                wi_ref, bi_ref, wo2_ref, bo2_ref, ln2g_ref, ln2b_ref,
                embg_ref, embb_ref, wp_ref, bp_ref, wc_ref, bc_ref,
                logits_ref, *, batch, seq_len):
    B, S = batch, seq_len
    scale = 1.0 / (HEAD_DIM ** 0.5)

    # Embedding LayerNorm on the flattened [B*S, H] rows (row-wise => batch-fold safe).
    # (Embedding gathers / sums are plain-JAX glue outside the kernel.)
    h = _layernorm(h_ref[...], embg_ref[...], embb_ref[...])          # [B*S, H] f32

    for l in range(N_LAYERS):
        # --- fused QKV projection: one [B*S, H] x [H, 3H] GEMM over the whole batch ---
        qkv = _mm(h, wqkv_ref[l]) + bqkv_ref[l]                       # [B*S, 3H] f32
        qkv_bf = qkv.astype(jnp.bfloat16)                             # cast ONCE per layer
        q = qkv_bf[:, 0:HIDDEN]
        k = qkv_bf[:, HIDDEN:2 * HIDDEN]
        v = qkv_bf[:, 2 * HIDDEN:3 * HIDDEN]

        # --- attention: scores / softmax per batch element (statically unrolled),
        #     per-head context kept in vregs and concatenated once (no masked VMEM stores) ---
        ctx_rows = []
        for b in range(B):
            r0 = b * S
            bias = mb_ref[b:b + 1, :]                                 # [1, S] key-mask bias
            head_ctx = []
            for hh in range(N_HEADS):
                lo, hi = hh * HEAD_DIM, (hh + 1) * HEAD_DIM
                qh = q[r0:r0 + S, lo:hi]                              # [S, DH] bf16
                kh = k[r0:r0 + S, lo:hi]
                vh = v[r0:r0 + S, lo:hi]
                s = _mm_nt_bf16(qh, kh) * scale + bias                # [S, S] f32
                s = s - jnp.max(s, axis=-1, keepdims=True)
                p = jnp.exp(s)
                p = p * pl.reciprocal(jnp.sum(p, axis=-1, keepdims=True), approx=True)
                head_ctx.append(
                    jnp.dot(p.astype(jnp.bfloat16), vh,
                            preferred_element_type=jnp.float32))      # [S, DH] f32
            ctx_rows.append(jnp.concatenate(head_ctx, axis=-1))       # [S, H] f32
        ctx = jnp.concatenate(ctx_rows, axis=0)                       # [B*S, H] f32

        attn_out = _mm(ctx, wo_ref[l]) + bo_ref[l]                    # [B*S, H]
        h = _layernorm(attn_out + h, ln1g_ref[l], ln1b_ref[l])        # residual folded into LN

        inter = _mm(h, wi_ref[l]) + bi_ref[l]                         # [B*S, I]
        # TODO(synk): HF BERT uses exact (erf) GELU; tanh approximation kept for EUP lowering.
        inter = jax.nn.gelu(inter, approximate=True)
        ffn_out = _mm(inter, wo2_ref[l]) + bo2_ref[l]                 # [B*S, H]
        h = _layernorm(ffn_out + h, ln2g_ref[l], ln2b_ref[l])

    # --- fused pooler + classifier on the [CLS] row of each batch element ---
    cls = jnp.concatenate([h[b * S:b * S + 1, :] for b in range(B)], axis=0)   # [B, H]
    pooled = jnp.tanh(_mm(cls, wp_ref[...]) + bp_ref[...])                     # [B, H]
    # TODO(synk): nn.Dropout(0.3) implemented as eval-mode identity (no RNG at inference).
    logits = _mm(pooled, wc_ref[...]) + bc_ref[...]                            # [B, LANE]
    logits_ref[...] = logits                                                   # lane-dense store


# ------------------------- deterministic parameter init -------------------------
def init_params(key):
    keys = jax.random.split(key, 10)

    def nrm(k, shape):
        return jax.random.normal(k, shape, jnp.float32) * 0.02

    def nrm_bf16(k, shape):
        # matmul weights stored bf16 once (MXU operand dtype) -> half the DMA / VMEM,
        # no per-use f32->bf16 converts in the kernel
        return nrm(k, shape).astype(jnp.bfloat16)

    p = {
        "word_emb": nrm(keys[0], (VOCAB, HIDDEN)),
        "pos_emb": nrm(keys[1], (MAX_POS, HIDDEN)),
        "type_emb": nrm(keys[2], (TYPE_VOCAB, HIDDEN)),
        "emb_ln_g": jnp.ones((1, HIDDEN), jnp.float32),
        "emb_ln_b": jnp.zeros((1, HIDDEN), jnp.float32),
        # stacked per-layer weights; QKV merged into a single [H, 3H] projection
        "wqkv": nrm_bf16(keys[3], (N_LAYERS, HIDDEN, 3 * HIDDEN)),
        "bqkv": jnp.zeros((N_LAYERS, 1, 3 * HIDDEN), jnp.float32),
        "wo":   nrm_bf16(keys[4], (N_LAYERS, HIDDEN, HIDDEN)),
        "bo":   jnp.zeros((N_LAYERS, 1, HIDDEN), jnp.float32),
        "ln1g": jnp.ones((N_LAYERS, 1, HIDDEN), jnp.float32),
        "ln1b": jnp.zeros((N_LAYERS, 1, HIDDEN), jnp.float32),
        "wi":   nrm_bf16(keys[5], (N_LAYERS, HIDDEN, INTERMEDIATE)),
        "bi":   jnp.zeros((N_LAYERS, 1, INTERMEDIATE), jnp.float32),
        "wo2":  nrm_bf16(keys[6], (N_LAYERS, INTERMEDIATE, HIDDEN)),
        "bo2":  jnp.zeros((N_LAYERS, 1, HIDDEN), jnp.float32),
        "ln2g": jnp.ones((N_LAYERS, 1, HIDDEN), jnp.float32),
        "ln2b": jnp.zeros((N_LAYERS, 1, HIDDEN), jnp.float32),
        "wp":   nrm_bf16(keys[7], (HIDDEN, HIDDEN)),        # pooler
        "bp":   jnp.zeros((1, HIDDEN), jnp.float32),
    }
    # classifier, lane-padded to 128 so the kernel's output store is lane-dense
    wc = nrm(keys[8], (HIDDEN, NUM_CLASSES))
    bc = jnp.zeros((NUM_CLASSES,), jnp.float32)
    p["wc_pad"] = (jnp.zeros((HIDDEN, LANE), jnp.float32)
                   .at[:, :NUM_CLASSES].set(wc).astype(jnp.bfloat16))
    p["bc_pad"] = jnp.zeros((1, LANE), jnp.float32).at[:, :NUM_CLASSES].set(bc)
    return p


# ---------------------------------- forward -------------------------------------
def nel_classifier_forward(params, input_ids, attention_mask):
    B, S = input_ids.shape

    # Embedding gathers + sum are plain-JAX glue; LayerNorm runs inside the kernel.
    # TODO(synk): token_type_ids assumed all-zero (type_emb[0] for every position).
    h = (params["word_emb"][input_ids]
         + params["pos_emb"][:S][None, :, :]
         + params["type_emb"][0][None, None, :]).astype(jnp.float32)          # [B, S, H]
    h = h.reshape(B * S, HIDDEN)                                              # batch folded

    # Extended attention mask: (1 - mask) * -10000, broadcast over query positions in-kernel.
    mb = (1.0 - attention_mask.astype(jnp.float32)) * MASK_NEG                # [B, S]

    weights = (
        params["wqkv"], params["bqkv"], params["wo"], params["bo"],
        params["ln1g"], params["ln1b"],
        params["wi"], params["bi"], params["wo2"], params["bo2"],
        params["ln2g"], params["ln2b"],
        params["emb_ln_g"], params["emb_ln_b"],
        params["wp"], params["bp"], params["wc_pad"], params["bc_pad"],
    )

    # Single kernel invocation, no grid: every operand is one resident whole-array VMEM
    # copy (no double-buffering, no per-step pipeline overhead). On a single-TC chip the
    # old grid=(B,) was only a serial loop; at these shapes folding the batch is also the
    # right call on v7x (per-element work is far below per-core launch overhead).
    vmem = pl.BlockSpec(memory_space=pltpu.MemorySpace.VMEM)

    logits_pad = pl.pallas_call(
        functools.partial(_nel_kernel, batch=B, seq_len=S),
        out_shape=jax.ShapeDtypeStruct((B, LANE), jnp.float32),
        in_specs=[vmem] * (2 + len(weights)),
        out_specs=vmem,
    )(h, mb, *weights)

    return logits_pad[:, :NUM_CLASSES]


# ------------------------------------ main ---------------------------------------
if __name__ == "__main__":
    key = jax.random.PRNGKey(0)
    k_param, k_ids = jax.random.split(key)

    B, S = 2, 8
    params = init_params(k_param)
    input_ids = jax.random.randint(k_ids, (B, S), 0, VOCAB, dtype=jnp.int32)
    attention_mask = jnp.array(
        [[1, 1, 1, 1, 1, 1, 1, 1],
         [1, 1, 1, 1, 1, 0, 0, 0]], dtype=jnp.int32)

    logits = jax.jit(nel_classifier_forward)(params, input_ids, attention_mask)
    logits = jax.block_until_ready(logits)
    assert logits.shape == (B, NUM_CLASSES) and logits.dtype == jnp.float32
    assert bool(jnp.all(jnp.isfinite(logits)))
    print("KERNEL_OK")
</pallas_src>

<mosaic_0001>
module attributes {stable_mosaic.version = 11 : i64} {
  func.func @_nel_kernel(%arg0: memref<16x32xf32, #tpu.memory_space<vmem>>, %arg1: memref<2x8xf32, #tpu.memory_space<vmem>>, %arg2: memref<2x32x96xbf16, #tpu.memory_space<vmem>>, %arg3: memref<2x1x96xf32, #tpu.memory_space<vmem>>, %arg4: memref<2x32x32xbf16, #tpu.memory_space<vmem>>, %arg5: memref<2x1x32xf32, #tpu.memory_space<vmem>>, %arg6: memref<2x1x32xf32, #tpu.memory_space<vmem>>, %arg7: memref<2x1x32xf32, #tpu.memory_space<vmem>>, %arg8: memref<2x32x64xbf16, #tpu.memory_space<vmem>>, %arg9: memref<2x1x64xf32, #tpu.memory_space<vmem>>, %arg10: memref<2x64x32xbf16, #tpu.memory_space<vmem>>, %arg11: memref<2x1x32xf32, #tpu.memory_space<vmem>>, %arg12: memref<2x1x32xf32, #tpu.memory_space<vmem>>, %arg13: memref<2x1x32xf32, #tpu.memory_space<vmem>>, %arg14: memref<1x32xf32, #tpu.memory_space<vmem>>, %arg15: memref<1x32xf32, #tpu.memory_space<vmem>>, %arg16: memref<32x32xbf16, #tpu.memory_space<vmem>>, %arg17: memref<1x32xf32, #tpu.memory_space<vmem>>, %arg18: memref<32x128xbf16, #tpu.memory_space<vmem>>, %arg19: memref<1x128xf32, #tpu.memory_space<vmem>>, %arg20: memref<2x128xf32, #tpu.memory_space<vmem>>) attributes {dimension_semantics = [], scalar_prefetch = 0 : i64, scratch_operands = 0 : i64, tpu.core_type = #tpu.core_type<tc>} {
    %c0 = arith.constant 0 : index
    %c0_0 = arith.constant 0 : index
    %0 = vector.load %arg0[%c0, %c0_0] : memref<16x32xf32, #tpu.memory_space<vmem>>, vector<16x32xf32>
    %c0_1 = arith.constant 0 : index
    %c0_2 = arith.constant 0 : index
    %1 = vector.load %arg14[%c0_1, %c0_2] : memref<1x32xf32, #tpu.memory_space<vmem>>, vector<1x32xf32>
    %c0_3 = arith.constant 0 : index
    %c0_4 = arith.constant 0 : index
    %2 = vector.load %arg15[%c0_3, %c0_4] : memref<1x32xf32, #tpu.memory_space<vmem>>, vector<1x32xf32>
    %cst = arith.constant dense<0.000000e+00> : vector<16xf32>
    %3 = vector.multi_reduction <add>, %0, %cst [1] : vector<16x32xf32> to vector<16xf32>
    %4 = vector.shape_cast %3 : vector<16xf32> to vector<16x1xf32>
    %cst_5 = arith.constant 3.200000e+01 : f32
    %5 = vector.broadcast %cst_5 : f32 to vector<16x1xf32>
    %6 = arith.divf %4, %5 : vector<16x1xf32>
    %7 = vector.broadcast %6 : vector<16x1xf32> to vector<16x32xf32>
    %8 = arith.subf %0, %7 : vector<16x32xf32>
    %9 = arith.mulf %8, %8 : vector<16x32xf32>
    %cst_6 = arith.constant dense<0.000000e+00> : vector<16xf32>
    %10 = vector.multi_reduction <add>, %9, %cst_6 [1] : vector<16x32xf32> to vector<16xf32>
    %11 = vector.shape_cast %10 : vector<16xf32> to vector<16x1xf32>
    %cst_7 = arith.constant 3.200000e+01 : f32
    %12 = vector.broadcast %cst_7 : f32 to vector<16x1xf32>
    %13 = arith.divf %11, %12 : vector<16x1xf32>
    %14 = vector.broadcast %6 : vector<16x1xf32> to vector<16x32xf32>
    %15 = arith.subf %0, %14 : vector<16x32xf32>
    %cst_8 = arith.constant 9.99999996E-13 : f32
    %16 = vector.broadcast %cst_8 : f32 to vector<16x1xf32>
    %17 = arith.addf %13, %16 : vector<16x1xf32>
    %18 = math.rsqrt %17 : vector<16x1xf32>
    %19 = vector.broadcast %18 : vector<16x1xf32> to vector<16x32xf32>
    %20 = arith.mulf %15, %19 : vector<16x32xf32>
    %21 = vector.broadcast %1 : vector<1x32xf32> to vector<16x32xf32>
    %22 = arith.mulf %20, %21 : vector<16x32xf32>
    %23 = vector.broadcast %2 : vector<1x32xf32> to vector<16x32xf32>
    %24 = arith.addf %22, %23 : vector<16x32xf32>
    %c0_9 = arith.constant 0 : index
    %c0_10 = arith.constant 0 : index
    %c0_11 = arith.constant 0 : index
    %25 = vector.load %arg2[%c0_9, %c0_10, %c0_11] : memref<2x32x96xbf16, #tpu.memory_space<vmem>>, vector<1x32x96xbf16>
    %26 = vector.shape_cast %25 : vector<1x32x96xbf16> to vector<32x96xbf16>
    %27 = arith.truncf %24 : vector<16x32xf32> to vector<16x32xbf16>
    %cst_12 = arith.constant dense<0.000000e+00> : vector<16x96xf32>
    %28 = tpu.matmul %27, %26, %cst_12 {dimension_numbers = #tpu.dot_dimension_numbers<[1], [0], [0], [1], [0, 0, 1, 1], [], []>} : vector<16x32xbf16>, vector<32x96xbf16>, vector<16x96xf32> -> vector<16x96xf32>
    %c0_13 = arith.constant 0 : index
    %c0_14 = arith.constant 0 : index
    %c0_15 = arith.constant 0 : index
    %29 = vector.load %arg3[%c0_13, %c0_14, %c0_15] : memref<2x1x96xf32, #tpu.memory_space<vmem>>, vector<1x1x96xf32>
    %30 = vector.shape_cast %29 : vector<1x1x96xf32> to vector<1x96xf32>
    %31 = vector.broadcast %30 : vector<1x96xf32> to vector<16x96xf32>
    %32 = arith.addf %28, %31 : vector<16x96xf32>
    %33 = arith.truncf %32 : vector<16x96xf32> to vector<16x96xbf16>
    %34 = vector.extract_strided_slice %33 {offsets = [0, 0], sizes = [16, 32], strides = [1, 1]} : vector<16x96xbf16> to vector<16x32xbf16>
    %35 = vector.extract_strided_slice %33 {offsets = [0, 32], sizes = [16, 32], strides = [1, 1]} : vector<16x96xbf16> to vector<16x32xbf16>
    %36 = vector.extract_strided_slice %33 {offsets = [0, 64], sizes = [16, 32], strides = [1, 1]} : vector<16x96xbf16> to vector<16x32xbf16>
    %c0_16 = arith.constant 0 : index
    %c0_17 = arith.constant 0 : index
    %37 = vector.load %arg1[%c0_16, %c0_17] : memref<2x8xf32, #tpu.memory_space<vmem>>, vector<1x8xf32>
    %38 = vector.extract_strided_slice %34 {offsets = [0, 0], sizes = [8, 8], strides = [1, 1]} : vector<16x32xbf16> to vector<8x8xbf16>
    %39 = vector.extract_strided_slice %35 {offsets = [0, 0], sizes = [8, 8], strides = [1, 1]} : vector<16x32xbf16> to vector<8x8xbf16>
    %40 = vector.extract_strided_slice %36 {offsets = [0, 0], sizes = [8, 8], strides = [1, 1]} : vector<16x32xbf16> to vector<8x8xbf16>
    %cst_18 = arith.constant dense<0.000000e+00> : vector<8x8xf32>
    %41 = tpu.matmul %38, %39, %cst_18 {dimension_numbers = #tpu.dot_dimension_numbers<[1], [1], [0], [0], [0, 0, 1, 0], [], []>} : vector<8x8xbf16>, vector<8x8xbf16>, vector<8x8xf32> -> vector<8x8xf32>
    %cst_19 = arith.constant 0.353553385 : f32
    %42 = vector.broadcast %cst_19 : f32 to vector<8x8xf32>
    %43 = arith.mulf %41, %42 : vector<8x8xf32>
    %44 = vector.broadcast %37 : vector<1x8xf32> to vector<8x8xf32>
    %45 = arith.addf %43, %44 : vector<8x8xf32>
    %cst_20 = arith.constant dense<0xFF800000> : vector<8xf32>
    %46 = vector.multi_reduction <maximumf>, %45, %cst_20 [1] : vector<8x8xf32> to vector<8xf32>
    %47 = vector.shape_cast %46 : vector<8xf32> to vector<8x1xf32>
    %48 = vector.broadcast %47 : vector<8x1xf32> to vector<8x8xf32>
    %49 = arith.subf %45, %48 : vector<8x8xf32>
    %50 = math.exp %49 : vector<8x8xf32>
    %cst_21 = arith.constant dense<0.000000e+00> : vector<8xf32>
    %51 = vector.multi_reduction <add>, %50, %cst_21 [1] : vector<8x8xf32> to vector<8xf32>
    %52 = vector.shape_cast %51 : vector<8xf32> to vector<8x1xf32>
    %53 = tpu.reciprocal %52 {approx = true} : vector<8x1xf32> -> vector<8x1xf32>
    %54 = vector.broadcast %53 : vector<8x1xf32> to vector<8x8xf32>
    %55 = arith.mulf %50, %54 : vector<8x8xf32>
    %56 = arith.truncf %55 : vector<8x8xf32> to vector<8x8xbf16>
    %cst_22 = arith.constant dense<0.000000e+00> : vector<8x8xf32>
    %57 = tpu.matmul %56, %40, %cst_22 {dimension_numbers = #tpu.dot_dimension_numbers<[1], [0], [0], [1], [0, 0, 1, 1], [], []>} : vector<8x8xbf16>, vector<8x8xbf16>, vector<8x8xf32> -> vector<8x8xf32>
    %58 = vector.extract_strided_slice %34 {offsets = [0, 8], sizes = [8, 8], strides = [1, 1]} : vector<16x32xbf16> to vector<8x8xbf16>
    %59 = vector.extract_strided_slice %35 {offsets = [0, 8], sizes = [8, 8], strides = [1, 1]} : vector<16x32xbf16> to vector<8x8xbf16>
    %60 = vector.extract_strided_slice %36 {offsets = [0, 8], sizes = [8, 8], strides = [1, 1]} : vector<16x32xbf16> to vector<8x8xbf16>
    %cst_23 = arith.constant dense<0.000000e+00> : vector<8x8xf32>
    %61 = tpu.matmul %58, %59, %cst_23 {dimension_numbers = #tpu.dot_dimension_numbers<[1], [1], [0], [0], [0, 0, 1, 0], [], []>} : vector<8x8xbf16>, vector<8x8xbf16>, vector<8x8xf32> -> vector<8x8xf32>
    %cst_24 = arith.constant 0.353553385 : f32
    %62 = vector.broadcast %cst_24 : f32 to vector<8x8xf32>
    %63 = arith.mulf %61, %62 : vector<8x8xf32>
    %64 = vector.broadcast %37 : vector<1x8xf32> to vector<8x8xf32>
    %65 = arith.addf %63, %64 : vector<8x8xf32>
    %cst_25 = arith.constant dense<0xFF800000> : vector<8xf32>
    %66 = vector.multi_reduction <maximumf>, %65, %cst_25 [1] : vector<8x8xf32> to vector<8xf32>
    %67 = vector.shape_cast %66 : vector<8xf32> to vector<8x1xf32>
    %68 = vector.broadcast %67 : vector<8x1xf32> to vector<8x8xf32>
    %69 = arith.subf %65, %68 : vector<8x8xf32>
    %70 = math.exp %69 : vector<8x8xf32>
    %cst_26 = arith.constant dense<0.000000e+00> : vector<8xf32>
    %71 = vector.multi_reduction <add>, %70, %cst_26 [1] : vector<8x8xf32> to vector<8xf32>
    %72 = vector.shape_cast %71 : vector<8xf32> to vector<8x1xf32>
    %73 = tpu.reciprocal %72 {approx = true} : vector<8x1xf32> -> vector<8x1xf32>
    %74 = vector.broadcast %73 : vector<8x1xf32> to vector<8x8xf32>
    %75 = arith.mulf %70, %74 : vector<8x8xf32>
    %76 = arith.truncf %75 : vector<8x8xf32> to vector<8x8xbf16>
    %cst_27 = arith.constant dense<0.000000e+00> : vector<8x8xf32>
    %77 = tpu.matmul %76, %60, %cst_27 {dimension_numbers = #tpu.dot_dimension_numbers<[1], [0], [0], [1], [0, 0, 1, 1], [], []>} : vector<8x8xbf16>, vector<8x8xbf16>, vector<8x8xf32> -> vector<8x8xf32>
    %78 = vector.extract_strided_slice %34 {offsets = [0, 16], sizes = [8, 8], strides = [1, 1]} : vector<16x32xbf16> to vector<8x8xbf16>
    %79 = vector.extract_strided_slice %35 {offsets = [0, 16], sizes = [8, 8], strides = [1, 1]} : vector<16x32xbf16> to vector<8x8xbf16>
    %80 = vector.extract_strided_slice %36 {offsets = [0, 16], sizes = [8, 8], strides = [1, 1]} : vector<16x32xbf16> to vector<8x8xbf16>
    %cst_28 = arith.constant dense<0.000000e+00> : vector<8x8xf32>
    %81 = tpu.matmul %78, %79, %cst_28 {dimension_numbers = #tpu.dot_dimension_numbers<[1], [1], [0], [0], [0, 0, 1, 0], [], []>} : vector<8x8xbf16>, vector<8x8xbf16>, vector<8x8xf32> -> vector<8x8xf32>
    %cst_29 = arith.constant 0.353553385 : f32
    %82 = vector.broadcast %cst_29 : f32 to vector<8x8xf32>
    %83 = arith.mulf %81, %82 : vector<8x8xf32>
    %84 = vector.broadcast %37 : vector<1x8xf32> to vector<8x8xf32>
    %85 = arith.addf %83, %84 : vector<8x8xf32>
    %cst_30 = arith.constant dense<0xFF800000> : vector<8xf32>
    %86 = vector.multi_reduction <maximumf>, %85, %cst_30 [1] : vector<8x8xf32> to vector<8xf32>
    %87 = vector.shape_cast %86 : vector<8xf32> to vector<8x1xf32>
    %88 = vector.broadcast %87 : vector<8x1xf32> to vector<8x8xf32>
    %89 = arith.subf %85, %88 : vector<8x8xf32>
    %90 = math.exp %89 : vector<8x8xf32>
    %cst_31 = arith.constant dense<0.000000e+00> : vector<8xf32>
    %91 = vector.multi_reduction <add>, %90, %cst_31 [1] : vector<8x8xf32> to vector<8xf32>
    %92 = vector.shape_cast %91 : vector<8xf32> to vector<8x1xf32>
    %93 = tpu.reciprocal %92 {approx = true} : vector<8x1xf32> -> vector<8x1xf32>
    %94 = vector.broadcast %93 : vector<8x1xf32> to vector<8x8xf32>
    %95 = arith.mulf %90, %94 : vector<8x8xf32>
    %96 = arith.truncf %95 : vector<8x8xf32> to vector<8x8xbf16>
    %cst_32 = arith.constant dense<0.000000e+00> : vector<8x8xf32>
    %97 = tpu.matmul %96, %80, %cst_32 {dimension_numbers = #tpu.dot_dimension_numbers<[1], [0], [0], [1], [0, 0, 1, 1], [], []>} : vector<8x8xbf16>, vector<8x8xbf16>, vector<8x8xf32> -> vector<8x8xf32>
    %98 = vector.extract_strided_slice %34 {offsets = [0, 24], sizes = [8, 8], strides = [1, 1]} : vector<16x32xbf16> to vector<8x8xbf16>
    %99 = vector.extract_strided_slice %35 {offsets = [0, 24], sizes = [8, 8], strides = [1, 1]} : vector<16x32xbf16> to vector<8x8xbf16>
    %100 = vector.extract_strided_slice %36 {offsets = [0, 24], sizes = [8, 8], strides = [1, 1]} : vector<16x32xbf16> to vector<8x8xbf16>
    %cst_33 = arith.constant dense<0.000000e+00> : vector<8x8xf32>
    %101 = tpu.matmul %98, %99, %cst_33 {dimension_numbers = #tpu.dot_dimension_numbers<[1], [1], [0], [0], [0, 0, 1, 0], [], []>} : vector<8x8xbf16>, vector<8x8xbf16>, vector<8x8xf32> -> vector<8x8xf32>
    %cst_34 = arith.constant 0.353553385 : f32
    %102 = vector.broadcast %cst_34 : f32 to vector<8x8xf32>
    %103 = arith.mulf %101, %102 : vector<8x8xf32>
    %104 = vector.broadcast %37 : vector<1x8xf32> to vector<8x8xf32>
    %105 = arith.addf %103, %104 : vector<8x8xf32>
    %cst_35 = arith.constant dense<0xFF800000> : vector<8xf32>
    %106 = vector.multi_reduction <maximumf>, %105, %cst_35 [1] : vector<8x8xf32> to vector<8xf32>
    %107 = vector.shape_cast %106 : vector<8xf32> to vector<8x1xf32>
    %108 = vector.broadcast %107 : vector<8x1xf32> to vector<8x8xf32>
    %109 = arith.subf %105, %108 : vector<8x8xf32>
    %110 = math.exp %109 : vector<8x8xf32>
    %cst_36 = arith.constant dense<0.000000e+00> : vector<8xf32>
    %111 = vector.multi_reduction <add>, %110, %cst_36 [1] : vector<8x8xf32> to vector<8xf32>
    %112 = vector.shape_cast %111 : vector<8xf32> to vector<8x1xf32>
    %113 = tpu.reciprocal %112 {approx = true} : vector<8x1xf32> -> vector<8x1xf32>
    %114 = vector.broadcast %113 : vector<8x1xf32> to vector<8x8xf32>
    %115 = arith.mulf %110, %114 : vector<8x8xf32>
    %116 = arith.truncf %115 : vector<8x8xf32> to vector<8x8xbf16>
    %cst_37 = arith.constant dense<0.000000e+00> : vector<8x8xf32>
    %117 = tpu.matmul %116, %100, %cst_37 {dimension_numbers = #tpu.dot_dimension_numbers<[1], [0], [0], [1], [0, 0, 1, 1], [], []>} : vector<8x8xbf16>, vector<8x8xbf16>, vector<8x8xf32> -> vector<8x8xf32>
    %118 = tpu.concatenate %57, %77, %97, %117 in 1 : vector<8x8xf32>, vector<8x8xf32>, vector<8x8xf32>, vector<8x8xf32> -> vector<8x32xf32>
    %c1 = arith.constant 1 : index
    %c0_38 = arith.constant 0 : index
    %119 = vector.load %arg1[%c1, %c0_38] : memref<2x8xf32, #tpu.memory_space<vmem>>, vector<1x8xf32>
    %120 = vector.extract_strided_slice %34 {offsets = [8, 0], sizes = [8, 8], strides = [1, 1]} : vector<16x32xbf16> to vector<8x8xbf16>
    %121 = vector.extract_strided_slice %35 {offsets = [8, 0], sizes = [8, 8], strides = [1, 1]} : vector<16x32xbf16> to vector<8x8xbf16>
    %122 = vector.extract_strided_slice %36 {offsets = [8, 0], sizes = [8, 8], strides = [1, 1]} : vector<16x32xbf16> to vector<8x8xbf16>
    %cst_39 = arith.constant dense<0.000000e+00> : vector<8x8xf32>
    %123 = tpu.matmul %120, %121, %cst_39 {dimension_numbers = #tpu.dot_dimension_numbers<[1], [1], [0], [0], [0, 0, 1, 0], [], []>} : vector<8x8xbf16>, vector<8x8xbf16>, vector<8x8xf32> -> vector<8x8xf32>
    %cst_40 = arith.constant 0.353553385 : f32
    %124 = vector.broadcast %cst_40 : f32 to vector<8x8xf32>
    %125 = arith.mulf %123, %124 : vector<8x8xf32>
    %126 = vector.broadcast %119 : vector<1x8xf32> to vector<8x8xf32>
    %127 = arith.addf %125, %126 : vector<8x8xf32>
    %cst_41 = arith.constant dense<0xFF800000> : vector<8xf32>
    %128 = vector.multi_reduction <maximumf>, %127, %cst_41 [1] : vector<8x8xf32> to vector<8xf32>
    %129 = vector.shape_cast %128 : vector<8xf32> to vector<8x1xf32>
    %130 = vector.broadcast %129 : vector<8x1xf32> to vector<8x8xf32>
    %131 = arith.subf %127, %130 : vector<8x8xf32>
    %132 = math.exp %131 : vector<8x8xf32>
    %cst_42 = arith.constant dense<0.000000e+00> : vector<8xf32>
    %133 = vector.multi_reduction <add>, %132, %cst_42 [1] : vector<8x8xf32> to vector<8xf32>
    %134 = vector.shape_cast %133 : vector<8xf32> to vector<8x1xf32>
    %135 = tpu.reciprocal %134 {approx = true} : vector<8x1xf32> -> vector<8x1xf32>
    %136 = vector.broadcast %135 : vector<8x1xf32> to vector<8x8xf32>
    %137 = arith.mulf %132, %136 : vector<8x8xf32>
    %138 = arith.truncf %137 : vector<8x8xf32> to vector<8x8xbf16>
    %cst_43 = arith.constant dense<0.000000e+00> : vector<8x8xf32>
    %139 = tpu.matmul %138, %122, %cst_43 {dimension_numbers = #tpu.dot_dimension_numbers<[1], [0], [0], [1], [0, 0, 1, 1], [], []>} : vector<8x8xbf16>, vector<8x8xbf16>, vector<8x8xf32> -> vector<8x8xf32>
    %140 = vector.extract_strided_slice %34 {offsets = [8, 8], sizes = [8, 8], strides = [1, 1]} : vector<16x32xbf16> to vector<8x8xbf16>
    %141 = vector.extract_strided_slice %35 {offsets = [8, 8], sizes = [8, 8], strides = [1, 1]} : vector<16x32xbf16> to vector<8x8xbf16>
    %142 = vector.extract_strided_slice %36 {offsets = [8, 8], sizes = [8, 8], strides = [1, 1]} : vector<16x32xbf16> to vector<8x8xbf16>
    %cst_44 = arith.constant dense<0.000000e+00> : vector<8x8xf32>
    %143 = tpu.matmul %140, %141, %cst_44 {dimension_numbers = #tpu.dot_dimension_numbers<[1], [1], [0], [0], [0, 0, 1, 0], [], []>} : vector<8x8xbf16>, vector<8x8xbf16>, vector<8x8xf32> -> vector<8x8xf32>
    %cst_45 = arith.constant 0.353553385 : f32
    %144 = vector.broadcast %cst_45 : f32 to vector<8x8xf32>
    %145 = arith.mulf %143, %144 : vector<8x8xf32>
    %146 = vector.broadcast %119 : vector<1x8xf32> to vector<8x8xf32>
    %147 = arith.addf %145, %146 : vector<8x8xf32>
    %cst_46 = arith.constant dense<0xFF800000> : vector<8xf32>
    %148 = vector.multi_reduction <maximumf>, %147, %cst_46 [1] : vector<8x8xf32> to vector<8xf32>
    %149 = vector.shape_cast %148 : vector<8xf32> to vector<8x1xf32>
    %150 = vector.broadcast %149 : vector<8x1xf32> to vector<8x8xf32>
    %151 = arith.subf %147, %150 : vector<8x8xf32>
    %152 = math.exp %151 : vector<8x8xf32>
    %cst_47 = arith.constant dense<0.000000e+00> : vector<8xf32>
    %153 = vector.multi_reduction <add>, %152, %cst_47 [1] : vector<8x8xf32> to vector<8xf32>
    %154 = vector.shape_cast %153 : vector<8xf32> to vector<8x1xf32>
    %155 = tpu.reciprocal %154 {approx = true} : vector<8x1xf32> -> vector<8x1xf32>
    %156 = vector.broadcast %155 : vector<8x1xf32> to vector<8x8xf32>
    %157 = arith.mulf %152, %156 : vector<8x8xf32>
    %158 = arith.truncf %157 : vector<8x8xf32> to vector<8x8xbf16>
    %cst_48 = arith.constant dense<0.000000e+00> : vector<8x8xf32>
    %159 = tpu.matmul %158, %142, %cst_48 {dimension_numbers = #tpu.dot_dimension_numbers<[1], [0], [0], [1], [0, 0, 1, 1], [], []>} : vector<8x8xbf16>, vector<8x8xbf16>, vector<8x8xf32> -> vector<8x8xf32>
    %160 = vector.extract_strided_slice %34 {offsets = [8, 16], sizes = [8, 8], strides = [1, 1]} : vector<16x32xbf16> to vector<8x8xbf16>
    %161 = vector.extract_strided_slice %35 {offsets = [8, 16], sizes = [8, 8], strides = [1, 1]} : vector<16x32xbf16> to vector<8x8xbf16>
    %162 = vector.extract_strided_slice %36 {offsets = [8, 16], sizes = [8, 8], strides = [1, 1]} : vector<16x32xbf16> to vector<8x8xbf16>
    %cst_49 = arith.constant dense<0.000000e+00> : vector<8x8xf32>
    %163 = tpu.matmul %160, %161, %cst_49 {dimension_numbers = #tpu.dot_dimension_numbers<[1], [1], [0], [0], [0, 0, 1, 0], [], []>} : vector<8x8xbf16>, vector<8x8xbf16>, vector<8x8xf32> -> vector<8x8xf32>
    %cst_50 = arith.constant 0.353553385 : f32
    %164 = vector.broadcast %cst_50 : f32 to vector<8x8xf32>
    %165 = arith.mulf %163, %164 : vector<8x8xf32>
    %166 = vector.broadcast %119 : vector<1x8xf32> to vector<8x8xf32>
    %167 = arith.addf %165, %166 : vector<8x8xf32>
    %cst_51 = arith.constant dense<0xFF800000> : vector<8xf32>
    %168 = vector.multi_reduction <maximumf>, %167, %cst_51 [1] : vector<8x8xf32> to vector<8xf32>
    %169 = vector.shape_cast %168 : vector<8xf32> to vector<8x1xf32>
    %170 = vector.broadcast %169 : vector<8x1xf32> to vector<8x8xf32>
    %171 = arith.subf %167, %170 : vector<8x8xf32>
    %172 = math.exp %171 : vector<8x8xf32>
    %cst_52 = arith.constant dense<0.000000e+00> : vector<8xf32>
    %173 = vector.multi_reduction <add>, %172, %cst_52 [1] : vector<8x8xf32> to vector<8xf32>
    %174 = vector.shape_cast %173 : vector<8xf32> to vector<8x1xf32>
    %175 = tpu.reciprocal %174 {approx = true} : vector<8x1xf32> -> vector<8x1xf32>
    %176 = vector.broadcast %175 : vector<8x1xf32> to vector<8x8xf32>
    %177 = arith.mulf %172, %176 : vector<8x8xf32>
    %178 = arith.truncf %177 : vector<8x8xf32> to vector<8x8xbf16>
    %cst_53 = arith.constant dense<0.000000e+00> : vector<8x8xf32>
    %179 = tpu.matmul %178, %162, %cst_53 {dimension_numbers = #tpu.dot_dimension_numbers<[1], [0], [0], [1], [0, 0, 1, 1], [], []>} : vector<8x8xbf16>, vector<8x8xbf16>, vector<8x8xf32> -> vector<8x8xf32>
    %180 = vector.extract_strided_slice %34 {offsets = [8, 24], sizes = [8, 8], strides = [1, 1]} : vector<16x32xbf16> to vector<8x8xbf16>
    %181 = vector.extract_strided_slice %35 {offsets = [8, 24], sizes = [8, 8], strides = [1, 1]} : vector<16x32xbf16> to vector<8x8xbf16>
    %182 = vector.extract_strided_slice %36 {offsets = [8, 24], sizes = [8, 8], strides = [1, 1]} : vector<16x32xbf16> to vector<8x8xbf16>
    %cst_54 = arith.constant dense<0.000000e+00> : vector<8x8xf32>
    %183 = tpu.matmul %180, %181, %cst_54 {dimension_numbers = #tpu.dot_dimension_numbers<[1], [1], [0], [0], [0, 0, 1, 0], [], []>} : vector<8x8xbf16>, vector<8x8xbf16>, vector<8x8xf32> -> vector<8x8xf32>
    %cst_55 = arith.constant 0.353553385 : f32
    %184 = vector.broadcast %cst_55 : f32 to vector<8x8xf32>
    %185 = arith.mulf %183, %184 : vector<8x8xf32>
    %186 = vector.broadcast %119 : vector<1x8xf32> to vector<8x8xf32>
    %187 = arith.addf %185, %186 : vector<8x8xf32>
    %cst_56 = arith.constant dense<0xFF800000> : vector<8xf32>
    %188 = vector.multi_reduction <maximumf>, %187, %cst_56 [1] : vector<8x8xf32> to vector<8xf32>
    %189 = vector.shape_cast %188 : vector<8xf32> to vector<8x1xf32>
    %190 = vector.broadcast %189 : vector<8x1xf32> to vector<8x8xf32>
    %191 = arith.subf %187, %190 : vector<8x8xf32>
    %192 = math.exp %191 : vector<8x8xf32>
    %cst_57 = arith.constant dense<0.000000e+00> : vector<8xf32>
    %193 = vector.multi_reduction <add>, %192, %cst_57 [1] : vector<8x8xf32> to vector<8xf32>
    %194 = vector.shape_cast %193 : vector<8xf32> to vector<8x1xf32>
    %195 = tpu.reciprocal %194 {approx = true} : vector<8x1xf32> -> vector<8x1xf32>
    %196 = vector.broadcast %195 : vector<8x1xf32> to vector<8x8xf32>
    %197 = arith.mulf %192, %196 : vector<8x8xf32>
    %198 = arith.truncf %197 : vector<8x8xf32> to vector<8x8xbf16>
    %cst_58 = arith.constant dense<0.000000e+00> : vector<8x8xf32>
    %199 = tpu.matmul %198, %182, %cst_58 {dimension_numbers = #tpu.dot_dimension_numbers<[1], [0], [0], [1], [0, 0, 1, 1], [], []>} : vector<8x8xbf16>, vector<8x8xbf16>, vector<8x8xf32> -> vector<8x8xf32>
    %200 = tpu.concatenate %139, %159, %179, %199 in 1 : vector<8x8xf32>, vector<8x8xf32>, vector<8x8xf32>, vector<8x8xf32> -> vector<8x32xf32>
    %201 = tpu.concatenate %118, %200 in 0 : vector<8x32xf32>, vector<8x32xf32> -> vector<16x32xf32>
    %c0_59 = arith.constant 0 : index
    %c0_60 = arith.constant 0 : index
    %c0_61 = arith.constant 0 : index
    %202 = vector.load %arg4[%c0_59, %c0_60, %c0_61] : memref<2x32x32xbf16, #tpu.memory_space<vmem>>, vector<1x32x32xbf16>
    %203 = vector.shape_cast %202 : vector<1x32x32xbf16> to vector<32x32xbf16>
    %204 = arith.truncf %201 : vector<16x32xf32> to vector<16x32xbf16>
    %cst_62 = arith.constant dense<0.000000e+00> : vector<16x32xf32>
    %205 = tpu.matmul %204, %203, %cst_62 {dimension_numbers = #tpu.dot_dimension_numbers<[1], [0], [0], [1], [0, 0, 1, 1], [], []>} : vector<16x32xbf16>, vector<32x32xbf16>, vector<16x32xf32> -> vector<16x32xf32>
    %c0_63 = arith.constant 0 : index
    %c0_64 = arith.constant 0 : index
    %c0_65 = arith.constant 0 : index
    %206 = vector.load %arg5[%c0_63, %c0_64, %c0_65] : memref<2x1x32xf32, #tpu.memory_space<vmem>>, vector<1x1x32xf32>
    %207 = vector.shape_cast %206 : vector<1x1x32xf32> to vector<1x32xf32>
    %208 = vector.broadcast %207 : vector<1x32xf32> to vector<16x32xf32>
    %209 = arith.addf %205, %208 : vector<16x32xf32>
    %210 = arith.addf %209, %24 : vector<16x32xf32>
    %c0_66 = arith.constant 0 : index
    %c0_67 = arith.constant 0 : index
    %c0_68 = arith.constant 0 : index
    %211 = vector.load %arg6[%c0_66, %c0_67, %c0_68] : memref<2x1x32xf32, #tpu.memory_space<vmem>>, vector<1x1x32xf32>
    %212 = vector.shape_cast %211 : vector<1x1x32xf32> to vector<1x32xf32>
    %c0_69 = arith.constant 0 : index
    %c0_70 = arith.constant 0 : index
    %c0_71 = arith.constant 0 : index
    %213 = vector.load %arg7[%c0_69, %c0_70, %c0_71] : memref<2x1x32xf32, #tpu.memory_space<vmem>>, vector<1x1x32xf32>
    %214 = vector.shape_cast %213 : vector<1x1x32xf32> to vector<1x32xf32>
    %cst_72 = arith.constant dense<0.000000e+00> : vector<16xf32>
    %215 = vector.multi_reduction <add>, %210, %cst_72 [1] : vector<16x32xf32> to vector<16xf32>
    %216 = vector.shape_cast %215 : vector<16xf32> to vector<16x1xf32>
    %cst_73 = arith.constant 3.200000e+01 : f32
    %217 = vector.broadcast %cst_73 : f32 to vector<16x1xf32>
    %218 = arith.divf %216, %217 : vector<16x1xf32>
    %219 = vector.broadcast %218 : vector<16x1xf32> to vector<16x32xf32>
    %220 = arith.subf %210, %219 : vector<16x32xf32>
    %221 = arith.mulf %220, %220 : vector<16x32xf32>
    %cst_74 = arith.constant dense<0.000000e+00> : vector<16xf32>
    %222 = vector.multi_reduction <add>, %221, %cst_74 [1] : vector<16x32xf32> to vector<16xf32>
    %223 = vector.shape_cast %222 : vector<16xf32> to vector<16x1xf32>
    %cst_75 = arith.constant 3.200000e+01 : f32
    %224 = vector.broadcast %cst_75 : f32 to vector<16x1xf32>
    %225 = arith.divf %223, %224 : vector<16x1xf32>
    %226 = vector.broadcast %218 : vector<16x1xf32> to vector<16x32xf32>
    %227 = arith.subf %210, %226 : vector<16x32xf32>
    %cst_76 = arith.constant 9.99999996E-13 : f32
    %228 = vector.broadcast %cst_76 : f32 to vector<16x1xf32>
    %229 = arith.addf %225, %228 : vector<16x1xf32>
    %230 = math.rsqrt %229 : vector<16x1xf32>
    %231 = vector.broadcast %230 : vector<16x1xf32> to vector<16x32xf32>
    %232 = arith.mulf %227, %231 : vector<16x32xf32>
    %233 = vector.broadcast %212 : vector<1x32xf32> to vector<16x32xf32>
    %234 = arith.mulf %232, %233 : vector<16x32xf32>
    %235 = vector.broadcast %214 : vector<1x32xf32> to vector<16x32xf32>
    %236 = arith.addf %234, %235 : vector<16x32xf32>
    %c0_77 = arith.constant 0 : index
    %c0_78 = arith.constant 0 : index
    %c0_79 = arith.constant 0 : index
    %237 = vector.load %arg8[%c0_77, %c0_78, %c0_79] : memref<2x32x64xbf16, #tpu.memory_space<vmem>>, vector<1x32x64xbf16>
    %238 = vector.shape_cast %237 : vector<1x32x64xbf16> to vector<32x64xbf16>
    %239 = arith.truncf %236 : vector<16x32xf32> to vector<16x32xbf16>
    %cst_80 = arith.constant dense<0.000000e+00> : vector<16x64xf32>
    %240 = tpu.matmul %239, %238, %cst_80 {dimension_numbers = #tpu.dot_dimension_numbers<[1], [0], [0], [1], [0, 0, 1, 1], [], []>} : vector<16x32xbf16>, vector<32x64xbf16>, vector<16x64xf32> -> vector<16x64xf32>
    %c0_81 = arith.constant 0 : index
    %c0_82 = arith.constant 0 : index
    %c0_83 = arith.constant 0 : index
    %241 = vector.load %arg9[%c0_81, %c0_82, %c0_83] : memref<2x1x64xf32, #tpu.memory_space<vmem>>, vector<1x1x64xf32>
    %242 = vector.shape_cast %241 : vector<1x1x64xf32> to vector<1x64xf32>
    %243 = vector.broadcast %242 : vector<1x64xf32> to vector<16x64xf32>
    %244 = arith.addf %240, %243 : vector<16x64xf32>
    %245 = arith.mulf %244, %244 : vector<16x64xf32>
    %246 = arith.mulf %244, %245 : vector<16x64xf32>
    %cst_84 = arith.constant 4.471500e-02 : f32
    %247 = vector.broadcast %cst_84 : f32 to vector<16x64xf32>
    %248 = arith.mulf %247, %246 : vector<16x64xf32>
    %249 = arith.addf %244, %248 : vector<16x64xf32>
    %cst_85 = arith.constant 0.797884583 : f32
    %250 = vector.broadcast %cst_85 : f32 to vector<16x64xf32>
    %251 = arith.mulf %250, %249 : vector<16x64xf32>
    %252 = math.tanh %251 : vector<16x64xf32>
    %cst_86 = arith.constant 1.000000e+00 : f32
    %253 = vector.broadcast %cst_86 : f32 to vector<16x64xf32>
    %254 = arith.addf %253, %252 : vector<16x64xf32>
    %cst_87 = arith.constant 5.000000e-01 : f32
    %255 = vector.broadcast %cst_87 : f32 to vector<16x64xf32>
    %256 = arith.mulf %255, %254 : vector<16x64xf32>
    %257 = arith.mulf %244, %256 : vector<16x64xf32>
    %c0_88 = arith.constant 0 : index
    %c0_89 = arith.constant 0 : index
    %c0_90 = arith.constant 0 : index
    %258 = vector.load %arg10[%c0_88, %c0_89, %c0_90] : memref<2x64x32xbf16, #tpu.memory_space<vmem>>, vector<1x64x32xbf16>
    %259 = vector.shape_cast %258 : vector<1x64x32xbf16> to vector<64x32xbf16>
    %260 = arith.truncf %257 : vector<16x64xf32> to vector<16x64xbf16>
    %cst_91 = arith.constant dense<0.000000e+00> : vector<16x32xf32>
    %261 = tpu.matmul %260, %259, %cst_91 {dimension_numbers = #tpu.dot_dimension_numbers<[1], [0], [0], [1], [0, 0, 1, 1], [], []>} : vector<16x64xbf16>, vector<64x32xbf16>, vector<16x32xf32> -> vector<16x32xf32>
    %c0_92 = arith.constant 0 : index
    %c0_93 = arith.constant 0 : index
    %c0_94 = arith.constant 0 : index
    %262 = vector.load %arg11[%c0_92, %c0_93, %c0_94] : memref<2x1x32xf32, #tpu.memory_space<vmem>>, vector<1x1x32xf32>
    %263 = vector.shape_cast %262 : vector<1x1x32xf32> to vector<1x32xf32>
    %264 = vector.broadcast %263 : vector<1x32xf32> to vector<16x32xf32>
    %265 = arith.addf %261, %264 : vector<16x32xf32>
    %266 = arith.addf %265, %236 : vector<16x32xf32>
    %c0_95 = arith.constant 0 : index
    %c0_96 = arith.constant 0 : index
    %c0_97 = arith.constant 0 : index
    %267 = vector.load %arg12[%c0_95, %c0_96, %c0_97] : memref<2x1x32xf32, #tpu.memory_space<vmem>>, vector<1x1x32xf32>
    %268 = vector.shape_cast %267 : vector<1x1x32xf32> to vector<1x32xf32>
    %c0_98 = arith.constant 0 : index
    %c0_99 = arith.constant 0 : index
    %c0_100 = arith.constant 0 : index
    %269 = vector.load %arg13[%c0_98, %c0_99, %c0_100] : memref<2x1x32xf32, #tpu.memory_space<vmem>>, vector<1x1x32xf32>
    %270 = vector.shape_cast %269 : vector<1x1x32xf32> to vector<1x32xf32>
    %cst_101 = arith.constant dense<0.000000e+00> : vector<16xf32>
    %271 = vector.multi_reduction <add>, %266, %cst_101 [1] : vector<16x32xf32> to vector<16xf32>
    %272 = vector.shape_cast %271 : vector<16xf32> to vector<16x1xf32>
    %cst_102 = arith.constant 3.200000e+01 : f32
    %273 = vector.broadcast %cst_102 : f32 to vector<16x1xf32>
    %274 = arith.divf %272, %273 : vector<16x1xf32>
    %275 = vector.broadcast %274 : vector<16x1xf32> to vector<16x32xf32>
    %276 = arith.subf %266, %275 : vector<16x32xf32>
    %277 = arith.mulf %276, %276 : vector<16x32xf32>
    %cst_103 = arith.constant dense<0.000000e+00> : vector<16xf32>
    %278 = vector.multi_reduction <add>, %277, %cst_103 [1] : vector<16x32xf32> to vector<16xf32>
    %279 = vector.shape_cast %278 : vector<16xf32> to vector<16x1xf32>
    %cst_104 = arith.constant 3.200000e+01 : f32
    %280 = vector.broadcast %cst_104 : f32 to vector<16x1xf32>
    %281 = arith.divf %279, %280 : vector<16x1xf32>
    %282 = vector.broadcast %274 : vector<16x1xf32> to vector<16x32xf32>
    %283 = arith.subf %266, %282 : vector<16x32xf32>
    %cst_105 = arith.constant 9.99999996E-13 : f32
    %284 = vector.broadcast %cst_105 : f32 to vector<16x1xf32>
    %285 = arith.addf %281, %284 : vector<16x1xf32>
    %286 = math.rsqrt %285 : vector<16x1xf32>
    %287 = vector.broadcast %286 : vector<16x1xf32> to vector<16x32xf32>
    %288 = arith.mulf %283, %287 : vector<16x32xf32>
    %289 = vector.broadcast %268 : vector<1x32xf32> to vector<16x32xf32>
    %290 = arith.mulf %288, %289 : vector<16x32xf32>
    %291 = vector.broadcast %270 : vector<1x32xf32> to vector<16x32xf32>
    %292 = arith.addf %290, %291 : vector<16x32xf32>
    %c1_106 = arith.constant 1 : index
    %c0_107 = arith.constant 0 : index
    %c0_108 = arith.constant 0 : index
    %293 = vector.load %arg2[%c1_106, %c0_107, %c0_108] : memref<2x32x96xbf16, #tpu.memory_space<vmem>>, vector<1x32x96xbf16>
    %294 = vector.shape_cast %293 : vector<1x32x96xbf16> to vector<32x96xbf16>
    %295 = arith.truncf %292 : vector<16x32xf32> to vector<16x32xbf16>
    %cst_109 = arith.constant dense<0.000000e+00> : vector<16x96xf32>
    %296 = tpu.matmul %295, %294, %cst_109 {dimension_numbers = #tpu.dot_dimension_numbers<[1], [0], [0], [1], [0, 0, 1, 1], [], []>} : vector<16x32xbf16>, vector<32x96xbf16>, vector<16x96xf32> -> vector<16x96xf32>
    %c1_110 = arith.constant 1 : index
    %c0_111 = arith.constant 0 : index
    %c0_112 = arith.constant 0 : index
    %297 = vector.load %arg3[%c1_110, %c0_111, %c0_112] : memref<2x1x96xf32, #tpu.memory_space<vmem>>, vector<1x1x96xf32>
    %298 = vector.shape_cast %297 : vector<1x1x96xf32> to vector<1x96xf32>
    %299 = vector.broadcast %298 : vector<1x96xf32> to vector<16x96xf32>
    %300 = arith.addf %296, %299 : vector<16x96xf32>
    %301 = arith.truncf %300 : vector<16x96xf32> to vector<16x96xbf16>
    %302 = vector.extract_strided_slice %301 {offsets = [0, 0], sizes = [16, 32], strides = [1, 1]} : vector<16x96xbf16> to vector<16x32xbf16>
    %303 = vector.extract_strided_slice %301 {offsets = [0, 32], sizes = [16, 32], strides = [1, 1]} : vector<16x96xbf16> to vector<16x32xbf16>
    %304 = vector.extract_strided_slice %301 {offsets = [0, 64], sizes = [16, 32], strides = [1, 1]} : vector<16x96xbf16> to vector<16x32xbf16>
    %c0_113 = arith.constant 0 : index
    %c0_114 = arith.constant 0 : index
    %305 = vector.load %arg1[%c0_113, %c0_114] : memref<2x8xf32, #tpu.memory_space<vmem>>, vector<1x8xf32>
    %306 = vector.extract_strided_slice %302 {offsets = [0, 0], sizes = [8, 8], strides = [1, 1]} : vector<16x32xbf16> to vector<8x8xbf16>
    %307 = vector.extract_strided_slice %303 {offsets = [0, 0], sizes = [8, 8], strides = [1, 1]} : vector<16x32xbf16> to vector<8x8xbf16>
    %308 = vector.extract_strided_slice %304 {offsets = [0, 0], sizes = [8, 8], strides = [1, 1]} : vector<16x32xbf16> to vector<8x8xbf16>
    %cst_115 = arith.constant dense<0.000000e+00> : vector<8x8xf32>
    %309 = tpu.matmul %306, %307, %cst_115 {dimension_numbers = #tpu.dot_dimension_numbers<[1], [1], [0], [0], [0, 0, 1, 0], [], []>} : vector<8x8xbf16>, vector<8x8xbf16>, vector<8x8xf32> -> vector<8x8xf32>
    %cst_116 = arith.constant 0.353553385 : f32
    %310 = vector.broadcast %cst_116 : f32 to vector<8x8xf32>
    %311 = arith.mulf %309, %310 : vector<8x8xf32>
    %312 = vector.broadcast %305 : vector<1x8xf32> to vector<8x8xf32>
    %313 = arith.addf %311, %312 : vector<8x8xf32>
    %cst_117 = arith.constant dense<0xFF800000> : vector<8xf32>
    %314 = vector.multi_reduction <maximumf>, %313, %cst_117 [1] : vector<8x8xf32> to vector<8xf32>
    %315 = vector.shape_cast %314 : vector<8xf32> to vector<8x1xf32>
    %316 = vector.broadcast %315 : vector<8x1xf32> to vector<8x8xf32>
    %317 = arith.subf %313, %316 : vector<8x8xf32>
    %318 = math.exp %317 : vector<8x8xf32>
    %cst_118 = arith.constant dense<0.000000e+00> : vector<8xf32>
    %319 = vector.multi_reduction <add>, %318, %cst_118 [1] : vector<8x8xf32> to vector<8xf32>
    %320 = vector.shape_cast %319 : vector<8xf32> to vector<8x1xf32>
    %321 = tpu.reciprocal %320 {approx = true} : vector<8x1xf32> -> vector<8x1xf32>
    %322 = vector.broadcast %321 : vector<8x1xf32> to vector<8x8xf32>
    %323 = arith.mulf %318, %322 : vector<8x8xf32>
    %324 = arith.truncf %323 : vector<8x8xf32> to vector<8x8xbf16>
    %cst_119 = arith.constant dense<0.000000e+00> : vector<8x8xf32>
    %325 = tpu.matmul %324, %308, %cst_119 {dimension_numbers = #tpu.dot_dimension_numbers<[1], [0], [0], [1], [0, 0, 1, 1], [], []>} : vector<8x8xbf16>, vector<8x8xbf16>, vector<8x8xf32> -> vector<8x8xf32>
    %326 = vector.extract_strided_slice %302 {offsets = [0, 8], sizes = [8, 8], strides = [1, 1]} : vector<16x32xbf16> to vector<8x8xbf16>
    %327 = vector.extract_strided_slice %303 {offsets = [0, 8], sizes = [8, 8], strides = [1, 1]} : vector<16x32xbf16> to vector<8x8xbf16>
    %328 = vector.extract_strided_slice %304 {offsets = [0, 8], sizes = [8, 8], strides = [1, 1]} : vector<16x32xbf16> to vector<8x8xbf16>
    %cst_120 = arith.constant dense<0.000000e+00> : vector<8x8xf32>
    %329 = tpu.matmul %326, %327, %cst_120 {dimension_numbers = #tpu.dot_dimension_numbers<[1], [1], [0], [0], [0, 0, 1, 0], [], []>} : vector<8x8xbf16>, vector<8x8xbf16>, vector<8x8xf32> -> vector<8x8xf32>
    %cst_121 = arith.constant 0.353553385 : f32
    %330 = vector.broadcast %cst_121 : f32 to vector<8x8xf32>
    %331 = arith.mulf %329, %330 : vector<8x8xf32>
    %332 = vector.broadcast %305 : vector<1x8xf32> to vector<8x8xf32>
    %333 = arith.addf %331, %332 : vector<8x8xf32>
    %cst_122 = arith.constant dense<0xFF800000> : vector<8xf32>
    %334 = vector.multi_reduction <maximumf>, %333, %cst_122 [1] : vector<8x8xf32> to vector<8xf32>
    %335 = vector.shape_cast %334 : vector<8xf32> to vector<8x1xf32>
    %336 = vector.broadcast %335 : vector<8x1xf32> to vector<8x8xf32>
    %337 = arith.subf %333, %336 : vector<8x8xf32>
    %338 = math.exp %337 : vector<8x8xf32>
    %cst_123 = arith.constant dense<0.000000e+00> : vector<8xf32>
    %339 = vector.multi_reduction <add>, %338, %cst_123 [1] : vector<8x8xf32> to vector<8xf32>
    %340 = vector.shape_cast %339 : vector<8xf32> to vector<8x1xf32>
    %341 = tpu.reciprocal %340 {approx = true} : vector<8x1xf32> -> vector<8x1xf32>
    %342 = vector.broadcast %341 : vector<8x1xf32> to vector<8x8xf32>
    %343 = arith.mulf %338, %342 : vector<8x8xf32>
    %344 = arith.truncf %343 : vector<8x8xf32> to vector<8x8xbf16>
    %cst_124 = arith.constant dense<0.000000e+00> : vector<8x8xf32>
    %345 = tpu.matmul %344, %328, %cst_124 {dimension_numbers = #tpu.dot_dimension_numbers<[1], [0], [0], [1], [0, 0, 1, 1], [], []>} : vector<8x8xbf16>, vector<8x8xbf16>, vector<8x8xf32> -> vector<8x8xf32>
    %346 = vector.extract_strided_slice %302 {offsets = [0, 16], sizes = [8, 8], strides = [1, 1]} : vector<16x32xbf16> to vector<8x8xbf16>
    %347 = vector.extract_strided_slice %303 {offsets = [0, 16], sizes = [8, 8], strides = [1, 1]} : vector<16x32xbf16> to vector<8x8xbf16>
    %348 = vector.extract_strided_slice %304 {offsets = [0, 16], sizes = [8, 8], strides = [1, 1]} : vector<16x32xbf16> to vector<8x8xbf16>
    %cst_125 = arith.constant dense<0.000000e+00> : vector<8x8xf32>
    %349 = tpu.matmul %346, %347, %cst_125 {dimension_numbers = #tpu.dot_dimension_numbers<[1], [1], [0], [0], [0, 0, 1, 0], [], []>} : vector<8x8xbf16>, vector<8x8xbf16>, vector<8x8xf32> -> vector<8x8xf32>
    %cst_126 = arith.constant 0.353553385 : f32
    %350 = vector.broadcast %cst_126 : f32 to vector<8x8xf32>
    %351 = arith.mulf %349, %350 : vector<8x8xf32>
    %352 = vector.broadcast %305 : vector<1x8xf32> to vector<8x8xf32>
    %353 = arith.addf %351, %352 : vector<8x8xf32>
    %cst_127 = arith.constant dense<0xFF800000> : vector<8xf32>
    %354 = vector.multi_reduction <maximumf>, %353, %cst_127 [1] : vector<8x8xf32> to vector<8xf32>
    %355 = vector.shape_cast %354 : vector<8xf32> to vector<8x1xf32>
    %356 = vector.broadcast %355 : vector<8x1xf32> to vector<8x8xf32>
    %357 = arith.subf %353, %356 : vector<8x8xf32>
    %358 = math.exp %357 : vector<8x8xf32>
    %cst_128 = arith.constant dense<0.000000e+00> : vector<8xf32>
    %359 = vector.multi_reduction <add>, %358, %cst_128 [1] : vector<8x8xf32> to vector<8xf32>
    %360 = vector.shape_cast %359 : vector<8xf32> to vector<8x1xf32>
    %361 = tpu.reciprocal %360 {approx = true} : vector<8x1xf32> -> vector<8x1xf32>
    %362 = vector.broadcast %361 : vector<8x1xf32> to vector<8x8xf32>
    %363 = arith.mulf %358, %362 : vector<8x8xf32>
    %364 = arith.truncf %363 : vector<8x8xf32> to vector<8x8xbf16>
    %cst_129 = arith.constant dense<0.000000e+00> : vector<8x8xf32>
    %365 = tpu.matmul %364, %348, %cst_129 {dimension_numbers = #tpu.dot_dimension_numbers<[1], [0], [0], [1], [0, 0, 1, 1], [], []>} : vector<8x8xbf16>, vector<8x8xbf16>, vector<8x8xf32> -> vector<8x8xf32>
    %366 = vector.extract_strided_slice %302 {offsets = [0, 24], sizes = [8, 8], strides = [1, 1]} : vector<16x32xbf16> to vector<8x8xbf16>
    %367 = vector.extract_strided_slice %303 {offsets = [0, 24], sizes = [8, 8], strides = [1, 1]} : vector<16x32xbf16> to vector<8x8xbf16>
    %368 = vector.extract_strided_slice %304 {offsets = [0, 24], sizes = [8, 8], strides = [1, 1]} : vector<16x32xbf16> to vector<8x8xbf16>
    %cst_130 = arith.constant dense<0.000000e+00> : vector<8x8xf32>
    %369 = tpu.matmul %366, %367, %cst_130 {dimension_numbers = #tpu.dot_dimension_numbers<[1], [1], [0], [0], [0, 0, 1, 0], [], []>} : vector<8x8xbf16>, vector<8x8xbf16>, vector<8x8xf32> -> vector<8x8xf32>
    %cst_131 = arith.constant 0.353553385 : f32
    %370 = vector.broadcast %cst_131 : f32 to vector<8x8xf32>
    %371 = arith.mulf %369, %370 : vector<8x8xf32>
    %372 = vector.broadcast %305 : vector<1x8xf32> to vector<8x8xf32>
    %373 = arith.addf %371, %372 : vector<8x8xf32>
    %cst_132 = arith.constant dense<0xFF800000> : vector<8xf32>
    %374 = vector.multi_reduction <maximumf>, %373, %cst_132 [1] : vector<8x8xf32> to vector<8xf32>
    %375 = vector.shape_cast %374 : vector<8xf32> to vector<8x1xf32>
    %376 = vector.broadcast %375 : vector<8x1xf32> to vector<8x8xf32>
    %377 = arith.subf %373, %376 : vector<8x8xf32>
    %378 = math.exp %377 : vector<8x8xf32>
    %cst_133 = arith.constant dense<0.000000e+00> : vector<8xf32>
    %379 = vector.multi_reduction <add>, %378, %cst_133 [1] : vector<8x8xf32> to vector<8xf32>
    %380 = vector.shape_cast %379 : vector<8xf32> to vector<8x1xf32>
    %381 = tpu.reciprocal %380 {approx = true} : vector<8x1xf32> -> vector<8x1xf32>
    %382 = vector.broadcast %381 : vector<8x1xf32> to vector<8x8xf32>
    %383 = arith.mulf %378, %382 : vector<8x8xf32>
    %384 = arith.truncf %383 : vector<8x8xf32> to vector<8x8xbf16>
    %cst_134 = arith.constant dense<0.000000e+00> : vector<8x8xf32>
    %385 = tpu.matmul %384, %368, %cst_134 {dimension_numbers = #tpu.dot_dimension_numbers<[1], [0], [0], [1], [0, 0, 1, 1], [], []>} : vector<8x8xbf16>, vector<8x8xbf16>, vector<8x8xf32> -> vector<8x8xf32>
    %386 = tpu.concatenate %325, %345, %365, %385 in 1 : vector<8x8xf32>, vector<8x8xf32>, vector<8x8xf32>, vector<8x8xf32> -> vector<8x32xf32>
    %c1_135 = arith.constant 1 : index
    %c0_136 = arith.constant 0 : index
    %387 = vector.load %arg1[%c1_135, %c0_136] : memref<2x8xf32, #tpu.memory_space<vmem>>, vector<1x8xf32>
    %388 = vector.extract_strided_slice %302 {offsets = [8, 0], sizes = [8, 8], strides = [1, 1]} : vector<16x32xbf16> to vector<8x8xbf16>
    %389 = vector.extract_strided_slice %303 {offsets = [8, 0], sizes = [8, 8], strides = [1, 1]} : vector<16x32xbf16> to vector<8x8xbf16>
    %390 = vector.extract_strided_slice %304 {offsets = [8, 0], sizes = [8, 8], strides = [1, 1]} : vector<16x32xbf16> to vector<8x8xbf16>
    %cst_137 = arith.constant dense<0.000000e+00> : vector<8x8xf32>
    %391 = tpu.matmul %388, %389, %cst_137 {dimension_numbers = #tpu.dot_dimension_numbers<[1], [1], [0], [0], [0, 0, 1, 0], [], []>} : vector<8x8xbf16>, vector<8x8xbf16>, vector<8x8xf32> -> vector<8x8xf32>
    %cst_138 = arith.constant 0.353553385 : f32
    %392 = vector.broadcast %cst_138 : f32 to vector<8x8xf32>
    %393 = arith.mulf %391, %392 : vector<8x8xf32>
    %394 = vector.broadcast %387 : vector<1x8xf32> to vector<8x8xf32>
    %395 = arith.addf %393, %394 : vector<8x8xf32>
    %cst_139 = arith.constant dense<0xFF800000> : vector<8xf32>
    %396 = vector.multi_reduction <maximumf>, %395, %cst_139 [1] : vector<8x8xf32> to vector<8xf32>
    %397 = vector.shape_cast %396 : vector<8xf32> to vector<8x1xf32>
    %398 = vector.broadcast %397 : vector<8x1xf32> to vector<8x8xf32>
    %399 = arith.subf %395, %398 : vector<8x8xf32>
    %400 = math.exp %399 : vector<8x8xf32>
    %cst_140 = arith.constant dense<0.000000e+00> : vector<8xf32>
    %401 = vector.multi_reduction <add>, %400, %cst_140 [1] : vector<8x8xf32> to vector<8xf32>
    %402 = vector.shape_cast %401 : vector<8xf32> to vector<8x1xf32>
    %403 = tpu.reciprocal %402 {approx = true} : vector<8x1xf32> -> vector<8x1xf32>
    %404 = vector.broadcast %403 : vector<8x1xf32> to vector<8x8xf32>
    %405 = arith.mulf %400, %404 : vector<8x8xf32>
    %406 = arith.truncf %405 : vector<8x8xf32> to vector<8x8xbf16>
    %cst_141 = arith.constant dense<0.000000e+00> : vector<8x8xf32>
    %407 = tpu.matmul %406, %390, %cst_141 {dimension_numbers = #tpu.dot_dimension_numbers<[1], [0], [0], [1], [0, 0, 1, 1], [], []>} : vector<8x8xbf16>, vector<8x8xbf16>, vector<8x8xf32> -> vector<8x8xf32>
    %408 = vector.extract_strided_slice %302 {offsets = [8, 8], sizes = [8, 8], strides = [1, 1]} : vector<16x32xbf16> to vector<8x8xbf16>
    %409 = vector.extract_strided_slice %303 {offsets = [8, 8], sizes = [8, 8], strides = [1, 1]} : vector<16x32xbf16> to vector<8x8xbf16>
    %410 = vector.extract_strided_slice %304 {offsets = [8, 8], sizes = [8, 8], strides = [1, 1]} : vector<16x32xbf16> to vector<8x8xbf16>
    %cst_142 = arith.constant dense<0.000000e+00> : vector<8x8xf32>
    %411 = tpu.matmul %408, %409, %cst_142 {dimension_numbers = #tpu.dot_dimension_numbers<[1], [1], [0], [0], [0, 0, 1, 0], [], []>} : vector<8x8xbf16>, vector<8x8xbf16>, vector<8x8xf32> -> vector<8x8xf32>
    %cst_143 = arith.constant 0.353553385 : f32
    %412 = vector.broadcast %cst_143 : f32 to vector<8x8xf32>
    %413 = arith.mulf %411, %412 : vector<8x8xf32>
    %414 = vector.broadcast %387 : vector<1x8xf32> to vector<8x8xf32>
    %415 = arith.addf %413, %414 : vector<8x8xf32>
    %cst_144 = arith.constant dense<0xFF800000> : vector<8xf32>
    %416 = vector.multi_reduction <maximumf>, %415, %cst_144 [1] : vector<8x8xf32> to vector<8xf32>
    %417 = vector.shape_cast %416 : vector<8xf32> to vector<8x1xf32>
    %418 = vector.broadcast %417 : vector<8x1xf32> to vector<8x8xf32>
    %419 = arith.subf %415, %418 : vector<8x8xf32>
    %420 = math.exp %419 : vector<8x8xf32>
    %cst_145 = arith.constant dense<0.000000e+00> : vector<8xf32>
    %421 = vector.multi_reduction <add>, %420, %cst_145 [1] : vector<8x8xf32> to vector<8xf32>
    %422 = vector.shape_cast %421 : vector<8xf32> to vector<8x1xf32>
    %423 = tpu.reciprocal %422 {approx = true} : vector<8x1xf32> -> vector<8x1xf32>
    %424 = vector.broadcast %423 : vector<8x1xf32> to vector<8x8xf32>
    %425 = arith.mulf %420, %424 : vector<8x8xf32>
    %426 = arith.truncf %425 : vector<8x8xf32> to vector<8x8xbf16>
    %cst_146 = arith.constant dense<0.000000e+00> : vector<8x8xf32>
    %427 = tpu.matmul %426, %410, %cst_146 {dimension_numbers = #tpu.dot_dimension_numbers<[1], [0], [0], [1], [0, 0, 1, 1], [], []>} : vector<8x8xbf16>, vector<8x8xbf16>, vector<8x8xf32> -> vector<8x8xf32>
    %428 = vector.extract_strided_slice %302 {offsets = [8, 16], sizes = [8, 8], strides = [1, 1]} : vector<16x32xbf16> to vector<8x8xbf16>
    %429 = vector.extract_strided_slice %303 {offsets = [8, 16], sizes = [8, 8], strides = [1, 1]} : vector<16x32xbf16> to vector<8x8xbf16>
    %430 = vector.extract_strided_slice %304 {offsets = [8, 16], sizes = [8, 8], strides = [1, 1]} : vector<16x32xbf16> to vector<8x8xbf16>
    %cst_147 = arith.constant dense<0.000000e+00> : vector<8x8xf32>
    %431 = tpu.matmul %428, %429, %cst_147 {dimension_numbers = #tpu.dot_dimension_numbers<[1], [1], [0], [0], [0, 0, 1, 0], [], []>} : vector<8x8xbf16>, vector<8x8xbf16>, vector<8x8xf32> -> vector<8x8xf32>
    %cst_148 = arith.constant 0.353553385 : f32
    %432 = vector.broadcast %cst_148 : f32 to vector<8x8xf32>
    %433 = arith.mulf %431, %432 : vector<8x8xf32>
    %434 = vector.broadcast %387 : vector<1x8xf32> to vector<8x8xf32>
    %435 = arith.addf %433, %434 : vector<8x8xf32>
    %cst_149 = arith.constant dense<0xFF800000> : vector<8xf32>
    %436 = vector.multi_reduction <maximumf>, %435, %cst_149 [1] : vector<8x8xf32> to vector<8xf32>
    %437 = vector.shape_cast %436 : vector<8xf32> to vector<8x1xf32>
    %438 = vector.broadcast %437 : vector<8x1xf32> to vector<8x8xf32>
    %439 = arith.subf %435, %438 : vector<8x8xf32>
    %440 = math.exp %439 : vector<8x8xf32>
    %cst_150 = arith.constant dense<0.000000e+00> : vector<8xf32>
    %441 = vector.multi_reduction <add>, %440, %cst_150 [1] : vector<8x8xf32> to vector<8xf32>
    %442 = vector.shape_cast %441 : vector<8xf32> to vector<8x1xf32>
    %443 = tpu.reciprocal %442 {approx = true} : vector<8x1xf32> -> vector<8x1xf32>
    %444 = vector.broadcast %443 : vector<8x1xf32> to vector<8x8xf32>
    %445 = arith.mulf %440, %444 : vector<8x8xf32>
    %446 = arith.truncf %445 : vector<8x8xf32> to vector<8x8xbf16>
    %cst_151 = arith.constant dense<0.000000e+00> : vector<8x8xf32>
    %447 = tpu.matmul %446, %430, %cst_151 {dimension_numbers = #tpu.dot_dimension_numbers<[1], [0], [0], [1], [0, 0, 1, 1], [], []>} : vector<8x8xbf16>, vector<8x8xbf16>, vector<8x8xf32> -> vector<8x8xf32>
    %448 = vector.extract_strided_slice %302 {offsets = [8, 24], sizes = [8, 8], strides = [1, 1]} : vector<16x32xbf16> to vector<8x8xbf16>
    %449 = vector.extract_strided_slice %303 {offsets = [8, 24], sizes = [8, 8], strides = [1, 1]} : vector<16x32xbf16> to vector<8x8xbf16>
    %450 = vector.extract_strided_slice %304 {offsets = [8, 24], sizes = [8, 8], strides = [1, 1]} : vector<16x32xbf16> to vector<8x8xbf16>
    %cst_152 = arith.constant dense<0.000000e+00> : vector<8x8xf32>
    %451 = tpu.matmul %448, %449, %cst_152 {dimension_numbers = #tpu.dot_dimension_numbers<[1], [1], [0], [0], [0, 0, 1, 0], [], []>} : vector<8x8xbf16>, vector<8x8xbf16>, vector<8x8xf32> -> vector<8x8xf32>
    %cst_153 = arith.constant 0.353553385 : f32
    %452 = vector.broadcast %cst_153 : f32 to vector<8x8xf32>
    %453 = arith.mulf %451, %452 : vector<8x8xf32>
    %454 = vector.broadcast %387 : vector<1x8xf32> to vector<8x8xf32>
    %455 = arith.addf %453, %454 : vector<8x8xf32>
    %cst_154 = arith.constant dense<0xFF800000> : vector<8xf32>
    %456 = vector.multi_reduction <maximumf>, %455, %cst_154 [1] : vector<8x8xf32> to vector<8xf32>
    %457 = vector.shape_cast %456 : vector<8xf32> to vector<8x1xf32>
    %458 = vector.broadcast %457 : vector<8x1xf32> to vector<8x8xf32>
    %459 = arith.subf %455, %458 : vector<8x8xf32>
    %460 = math.exp %459 : vector<8x8xf32>
    %cst_155 = arith.constant dense<0.000000e+00> : vector<8xf32>
    %461 = vector.multi_reduction <add>, %460, %cst_155 [1] : vector<8x8xf32> to vector<8xf32>
    %462 = vector.shape_cast %461 : vector<8xf32> to vector<8x1xf32>
    %463 = tpu.reciprocal %462 {approx = true} : vector<8x1xf32> -> vector<8x1xf32>
    %464 = vector.broadcast %463 : vector<8x1xf32> to vector<8x8xf32>
    %465 = arith.mulf %460, %464 : vector<8x8xf32>
    %466 = arith.truncf %465 : vector<8x8xf32> to vector<8x8xbf16>
    %cst_156 = arith.constant dense<0.000000e+00> : vector<8x8xf32>
    %467 = tpu.matmul %466, %450, %cst_156 {dimension_numbers = #tpu.dot_dimension_numbers<[1], [0], [0], [1], [0, 0, 1, 1], [], []>} : vector<8x8xbf16>, vector<8x8xbf16>, vector<8x8xf32> -> vector<8x8xf32>
    %468 = tpu.concatenate %407, %427, %447, %467 in 1 : vector<8x8xf32>, vector<8x8xf32>, vector<8x8xf32>, vector<8x8xf32> -> vector<8x32xf32>
    %469 = tpu.concatenate %386, %468 in 0 : vector<8x32xf32>, vector<8x32xf32> -> vector<16x32xf32>
    %c1_157 = arith.constant 1 : index
    %c0_158 = arith.constant 0 : index
    %c0_159 = arith.constant 0 : index
    %470 = vector.load %arg4[%c1_157, %c0_158, %c0_159] : memref<2x32x32xbf16, #tpu.memory_space<vmem>>, vector<1x32x32xbf16>
    %471 = vector.shape_cast %470 : vector<1x32x32xbf16> to vector<32x32xbf16>
    %472 = arith.truncf %469 : vector<16x32xf32> to vector<16x32xbf16>
    %cst_160 = arith.constant dense<0.000000e+00> : vector<16x32xf32>
    %473 = tpu.matmul %472, %471, %cst_160 {dimension_numbers = #tpu.dot_dimension_numbers<[1], [0], [0], [1], [0, 0, 1, 1], [], []>} : vector<16x32xbf16>, vector<32x32xbf16>, vector<16x32xf32> -> vector<16x32xf32>
    %c1_161 = arith.constant 1 : index
    %c0_162 = arith.constant 0 : index
    %c0_163 = arith.constant 0 : index
    %474 = vector.load %arg5[%c1_161, %c0_162, %c0_163] : memref<2x1x32xf32, #tpu.memory_space<vmem>>, vector<1x1x32xf32>
    %475 = vector.shape_cast %474 : vector<1x1x32xf32> to vector<1x32xf32>
    %476 = vector.broadcast %475 : vector<1x32xf32> to vector<16x32xf32>
    %477 = arith.addf %473, %476 : vector<16x32xf32>
    %478 = arith.addf %477, %292 : vector<16x32xf32>
    %c1_164 = arith.constant 1 : index
    %c0_165 = arith.constant 0 : index
    %c0_166 = arith.constant 0 : index
    %479 = vector.load %arg6[%c1_164, %c0_165, %c0_166] : memref<2x1x32xf32, #tpu.memory_space<vmem>>, vector<1x1x32xf32>
    %480 = vector.shape_cast %479 : vector<1x1x32xf32> to vector<1x32xf32>
    %c1_167 = arith.constant 1 : index
    %c0_168 = arith.constant 0 : index
    %c0_169 = arith.constant 0 : index
    %481 = vector.load %arg7[%c1_167, %c0_168, %c0_169] : memref<2x1x32xf32, #tpu.memory_space<vmem>>, vector<1x1x32xf32>
    %482 = vector.shape_cast %481 : vector<1x1x32xf32> to vector<1x32xf32>
    %cst_170 = arith.constant dense<0.000000e+00> : vector<16xf32>
    %483 = vector.multi_reduction <add>, %478, %cst_170 [1] : vector<16x32xf32> to vector<16xf32>
    %484 = vector.shape_cast %483 : vector<16xf32> to vector<16x1xf32>
    %cst_171 = arith.constant 3.200000e+01 : f32
    %485 = vector.broadcast %cst_171 : f32 to vector<16x1xf32>
    %486 = arith.divf %484, %485 : vector<16x1xf32>
    %487 = vector.broadcast %486 : vector<16x1xf32> to vector<16x32xf32>
    %488 = arith.subf %478, %487 : vector<16x32xf32>
    %489 = arith.mulf %488, %488 : vector<16x32xf32>
    %cst_172 = arith.constant dense<0.000000e+00> : vector<16xf32>
    %490 = vector.multi_reduction <add>, %489, %cst_172 [1] : vector<16x32xf32> to vector<16xf32>
    %491 = vector.shape_cast %490 : vector<16xf32> to vector<16x1xf32>
    %cst_173 = arith.constant 3.200000e+01 : f32
    %492 = vector.broadcast %cst_173 : f32 to vector<16x1xf32>
    %493 = arith.divf %491, %492 : vector<16x1xf32>
    %494 = vector.broadcast %486 : vector<16x1xf32> to vector<16x32xf32>
    %495 = arith.subf %478, %494 : vector<16x32xf32>
    %cst_174 = arith.constant 9.99999996E-13 : f32
    %496 = vector.broadcast %cst_174 : f32 to vector<16x1xf32>
    %497 = arith.addf %493, %496 : vector<16x1xf32>
    %498 = math.rsqrt %497 : vector<16x1xf32>
    %499 = vector.broadcast %498 : vector<16x1xf32> to vector<16x32xf32>
    %500 = arith.mulf %495, %499 : vector<16x32xf32>
    %501 = vector.broadcast %480 : vector<1x32xf32> to vector<16x32xf32>
    %502 = arith.mulf %500, %501 : vector<16x32xf32>
    %503 = vector.broadcast %482 : vector<1x32xf32> to vector<16x32xf32>
    %504 = arith.addf %502, %503 : vector<16x32xf32>
    %c1_175 = arith.constant 1 : index
    %c0_176 = arith.constant 0 : index
    %c0_177 = arith.constant 0 : index
    %505 = vector.load %arg8[%c1_175, %c0_176, %c0_177] : memref<2x32x64xbf16, #tpu.memory_space<vmem>>, vector<1x32x64xbf16>
    %506 = vector.shape_cast %505 : vector<1x32x64xbf16> to vector<32x64xbf16>
    %507 = arith.truncf %504 : vector<16x32xf32> to vector<16x32xbf16>
    %cst_178 = arith.constant dense<0.000000e+00> : vector<16x64xf32>
    %508 = tpu.matmul %507, %506, %cst_178 {dimension_numbers = #tpu.dot_dimension_numbers<[1], [0], [0], [1], [0, 0, 1, 1], [], []>} : vector<16x32xbf16>, vector<32x64xbf16>, vector<16x64xf32> -> vector<16x64xf32>
    %c1_179 = arith.constant 1 : index
    %c0_180 = arith.constant 0 : index
    %c0_181 = arith.constant 0 : index
    %509 = vector.load %arg9[%c1_179, %c0_180, %c0_181] : memref<2x1x64xf32, #tpu.memory_space<vmem>>, vector<1x1x64xf32>
    %510 = vector.shape_cast %509 : vector<1x1x64xf32> to vector<1x64xf32>
    %511 = vector.broadcast %510 : vector<1x64xf32> to vector<16x64xf32>
    %512 = arith.addf %508, %511 : vector<16x64xf32>
    %513 = arith.mulf %512, %512 : vector<16x64xf32>
    %514 = arith.mulf %512, %513 : vector<16x64xf32>
    %cst_182 = arith.constant 4.471500e-02 : f32
    %515 = vector.broadcast %cst_182 : f32 to vector<16x64xf32>
    %516 = arith.mulf %515, %514 : vector<16x64xf32>
    %517 = arith.addf %512, %516 : vector<16x64xf32>
    %cst_183 = arith.constant 0.797884583 : f32
    %518 = vector.broadcast %cst_183 : f32 to vector<16x64xf32>
    %519 = arith.mulf %518, %517 : vector<16x64xf32>
    %520 = math.tanh %519 : vector<16x64xf32>
    %cst_184 = arith.constant 1.000000e+00 : f32
    %521 = vector.broadcast %cst_184 : f32 to vector<16x64xf32>
    %522 = arith.addf %521, %520 : vector<16x64xf32>
    %cst_185 = arith.constant 5.000000e-01 : f32
    %523 = vector.broadcast %cst_185 : f32 to vector<16x64xf32>
    %524 = arith.mulf %523, %522 : vector<16x64xf32>
    %525 = arith.mulf %512, %524 : vector<16x64xf32>
    %c1_186 = arith.constant 1 : index
    %c0_187 = arith.constant 0 : index
    %c0_188 = arith.constant 0 : index
    %526 = vector.load %arg10[%c1_186, %c0_187, %c0_188] : memref<2x64x32xbf16, #tpu.memory_space<vmem>>, vector<1x64x32xbf16>
    %527 = vector.shape_cast %526 : vector<1x64x32xbf16> to vector<64x32xbf16>
    %528 = arith.truncf %525 : vector<16x64xf32> to vector<16x64xbf16>
    %cst_189 = arith.constant dense<0.000000e+00> : vector<16x32xf32>
    %529 = tpu.matmul %528, %527, %cst_189 {dimension_numbers = #tpu.dot_dimension_numbers<[1], [0], [0], [1], [0, 0, 1, 1], [], []>} : vector<16x64xbf16>, vector<64x32xbf16>, vector<16x32xf32> -> vector<16x32xf32>
    %c1_190 = arith.constant 1 : index
    %c0_191 = arith.constant 0 : index
    %c0_192 = arith.constant 0 : index
    %530 = vector.load %arg11[%c1_190, %c0_191, %c0_192] : memref<2x1x32xf32, #tpu.memory_space<vmem>>, vector<1x1x32xf32>
    %531 = vector.shape_cast %530 : vector<1x1x32xf32> to vector<1x32xf32>
    %532 = vector.broadcast %531 : vector<1x32xf32> to vector<16x32xf32>
    %533 = arith.addf %529, %532 : vector<16x32xf32>
    %534 = arith.addf %533, %504 : vector<16x32xf32>
    %c1_193 = arith.constant 1 : index
    %c0_194 = arith.constant 0 : index
    %c0_195 = arith.constant 0 : index
    %535 = vector.load %arg12[%c1_193, %c0_194, %c0_195] : memref<2x1x32xf32, #tpu.memory_space<vmem>>, vector<1x1x32xf32>
    %536 = vector.shape_cast %535 : vector<1x1x32xf32> to vector<1x32xf32>
    %c1_196 = arith.constant 1 : index
    %c0_197 = arith.constant 0 : index
    %c0_198 = arith.constant 0 : index
    %537 = vector.load %arg13[%c1_196, %c0_197, %c0_198] : memref<2x1x32xf32, #tpu.memory_space<vmem>>, vector<1x1x32xf32>
    %538 = vector.shape_cast %537 : vector<1x1x32xf32> to vector<1x32xf32>
    %cst_199 = arith.constant dense<0.000000e+00> : vector<16xf32>
    %539 = vector.multi_reduction <add>, %534, %cst_199 [1] : vector<16x32xf32> to vector<16xf32>
    %540 = vector.shape_cast %539 : vector<16xf32> to vector<16x1xf32>
    %cst_200 = arith.constant 3.200000e+01 : f32
    %541 = vector.broadcast %cst_200 : f32 to vector<16x1xf32>
    %542 = arith.divf %540, %541 : vector<16x1xf32>
    %543 = vector.broadcast %542 : vector<16x1xf32> to vector<16x32xf32>
    %544 = arith.subf %534, %543 : vector<16x32xf32>
    %545 = arith.mulf %544, %544 : vector<16x32xf32>
    %cst_201 = arith.constant dense<0.000000e+00> : vector<16xf32>
    %546 = vector.multi_reduction <add>, %545, %cst_201 [1] : vector<16x32xf32> to vector<16xf32>
    %547 = vector.shape_cast %546 : vector<16xf32> to vector<16x1xf32>
    %cst_202 = arith.constant 3.200000e+01 : f32
    %548 = vector.broadcast %cst_202 : f32 to vector<16x1xf32>
    %549 = arith.divf %547, %548 : vector<16x1xf32>
    %550 = vector.broadcast %542 : vector<16x1xf32> to vector<16x32xf32>
    %551 = arith.subf %534, %550 : vector<16x32xf32>
    %cst_203 = arith.constant 9.99999996E-13 : f32
    %552 = vector.broadcast %cst_203 : f32 to vector<16x1xf32>
    %553 = arith.addf %549, %552 : vector<16x1xf32>
    %554 = math.rsqrt %553 : vector<16x1xf32>
    %555 = vector.broadcast %554 : vector<16x1xf32> to vector<16x32xf32>
    %556 = arith.mulf %551, %555 : vector<16x32xf32>
    %557 = vector.broadcast %536 : vector<1x32xf32> to vector<16x32xf32>
    %558 = arith.mulf %556, %557 : vector<16x32xf32>
    %559 = vector.broadcast %538 : vector<1x32xf32> to vector<16x32xf32>
    %560 = arith.addf %558, %559 : vector<16x32xf32>
    %561 = vector.extract_strided_slice %560 {offsets = [0, 0], sizes = [1, 32], strides = [1, 1]} : vector<16x32xf32> to vector<1x32xf32>
    %562 = vector.extract_strided_slice %560 {offsets = [8, 0], sizes = [1, 32], strides = [1, 1]} : vector<16x32xf32> to vector<1x32xf32>
    %563 = tpu.concatenate %561, %562 in 0 : vector<1x32xf32>, vector<1x32xf32> -> vector<2x32xf32>
    %c0_204 = arith.constant 0 : index
    %c0_205 = arith.constant 0 : index
    %564 = vector.load %arg16[%c0_204, %c0_205] : memref<32x32xbf16, #tpu.memory_space<vmem>>, vector<32x32xbf16>
    %565 = arith.truncf %563 : vector<2x32xf32> to vector<2x32xbf16>
    %cst_206 = arith.constant dense<0.000000e+00> : vector<2x32xf32>
    %566 = tpu.matmul %565, %564, %cst_206 {dimension_numbers = #tpu.dot_dimension_numbers<[1], [0], [0], [1], [0, 0, 1, 1], [], []>} : vector<2x32xbf16>, vector<32x32xbf16>, vector<2x32xf32> -> vector<2x32xf32>
    %c0_207 = arith.constant 0 : index
    %c0_208 = arith.constant 0 : index
    %567 = vector.load %arg17[%c0_207, %c0_208] : memref<1x32xf32, #tpu.memory_space<vmem>>, vector<1x32xf32>
    %568 = vector.broadcast %567 : vector<1x32xf32> to vector<2x32xf32>
    %569 = arith.addf %566, %568 : vector<2x32xf32>
    %570 = math.tanh %569 : vector<2x32xf32>
    %c0_209 = arith.constant 0 : index
    %c0_210 = arith.constant 0 : index
    %571 = vector.load %arg18[%c0_209, %c0_210] : memref<32x128xbf16, #tpu.memory_space<vmem>>, vector<32x128xbf16>
    %572 = arith.truncf %570 : vector<2x32xf32> to vector<2x32xbf16>
    %cst_211 = arith.constant dense<0.000000e+00> : vector<2x128xf32>
    %573 = tpu.matmul %572, %571, %cst_211 {dimension_numbers = #tpu.dot_dimension_numbers<[1], [0], [0], [1], [0, 0, 1, 1], [], []>} : vector<2x32xbf16>, vector<32x128xbf16>, vector<2x128xf32> -> vector<2x128xf32>
    %c0_212 = arith.constant 0 : index
    %c0_213 = arith.constant 0 : index
    %574 = vector.load %arg19[%c0_212, %c0_213] : memref<1x128xf32, #tpu.memory_space<vmem>>, vector<1x128xf32>
    %575 = vector.broadcast %574 : vector<1x128xf32> to vector<2x128xf32>
    %576 = arith.addf %573, %575 : vector<2x128xf32>
    %c0_214 = arith.constant 0 : index
    %c0_215 = arith.constant 0 : index
    %577 = vector.load %arg20[%c0_214, %c0_215] : memref<2x128xf32, #tpu.memory_space<vmem>>, vector<2x128xf32>
    tpu.vector_store %arg20[%c0_214, %c0_215], %576 {strides = array<i32>} : memref<2x128xf32, #tpu.memory_space<vmem>>, vector<2x128xf32>,
    return
  }
}

</mosaic_0001>

<bundles_post_ra>
// kernel: nel_classifier_forward.1
= control target key start
LH: loop header
LB: loop body
LE: loop exit
PB: predicated region body
PF: predicated region fallthrough
CT: control target
= control target key end

     0   :  { %s2849_s0 = inlined_call_operand.vmem [shape: f32[16,32], index: 0, kind: input, shape index: {}]   ;;  %s2850_s1 = inlined_call_operand.vmem [shape: f32[2,8], index: 1, kind: input, shape index: {}]   ;;  %s2851_s2 = inlined_call_operand.vmem [shape: bf16[2,32,96], index: 2, kind: input, shape index: {}]   ;;  %s2852_s3 = inlined_call_operand.vmem [shape: f32[2,1,96], index: 3, kind: input, shape index: {}]   ;;  %s2853_s4 = inlined_call_operand.vmem [shape: bf16[2,32,32], index: 4, kind: input, shape index: {}]   ;;  %s2854_s5 = inlined_call_operand.vmem [shape: f32[2,1,32], index: 5, kind: input, shape index: {}]   ;;  %s2855_s6 = inlined_call_operand.vmem [shape: f32[2,1,32], index: 6, kind: input, shape index: {}]   ;;  %s2856_s7 = inlined_call_operand.vmem [shape: f32[2,1,32], index: 7, kind: input, shape index: {}]   ;;  %s2857_s8 = inlined_call_operand.vmem [shape: bf16[2,32,64], index: 8, kind: input, shape index: {}]   ;;  %s2858_s9 = inlined_call_operand.vmem [shape: f32[2,1,64], index: 9, kind: input, shape index: {}]   ;;  %s2859_s10 = inlined_call_operand.vmem [shape: bf16[2,64,32], index: 10, kind: input, shape index: {}]   ;;  %s2860_s11 = inlined_call_operand.vmem [shape: f32[2,1,32], index: 11, kind: input, shape index: {}]   ;;  %s2861_s12 = inlined_call_operand.vmem [shape: f32[2,1,32], index: 12, kind: input, shape index: {}]   ;;  %s2862_s13 = inlined_call_operand.vmem [shape: f32[2,1,32], index: 13, kind: input, shape index: {}]   ;;  %s2863_s14 = inlined_call_operand.vmem [shape: f32[1,32], index: 14, kind: input, shape index: {}]   ;;  %s2864_s15 = inlined_call_operand.vmem [shape: f32[1,32], index: 15, kind: input, shape index: {}]   ;;  %s2865_s16 = inlined_call_operand.vmem [shape: bf16[32,32], index: 16, kind: input, shape index: {}]   ;;  %s2866_s17 = inlined_call_operand.vmem [shape: f32[1,32], index: 17, kind: input, shape index: {}]   ;;  %s2867_s18 = inlined_call_operand.vmem [shape: bf16[32,128], index: 18, kind: input, shape index: {}]   ;;  %s2868_s19 = inlined_call_operand.vmem [shape: f32[1,128], index: 19, kind: input, shape index: {}]   ;;  %s2869_s20 = inlined_call_operand.hbm [shape: f32[2,128], index: 20, kind: output, shape index: {}]  }
   0x1   :  { %2892 = sst [smem:[#allocation5_spill]] %s2849_s0 }
   0x2   :  { %2893 = sst [smem:[#allocation6_spill]] %s2850_s1 }
   0x3   :  { %2894 = sst [smem:[#allocation7_spill]] %s2851_s2 }
   0x4   :  { %2895 = sst [smem:[#allocation8_spill]] %s2852_s3 }
   0x5   :  { %2896 = sst [smem:[#allocation9_spill]] %s2853_s4 }
   0x6   :  { %s2897_s23 = sld [smem:[#allocation5_spill]]  ;;  %vm71_vm0 = vcmask 261120  }
   0xc   :  { %v67_v0 = vld [vmem:[%s2897_s23] sm:$0xff]  ;;  %v68_v1 = vld [vmem:[%s2897_s23 + $0x8] sm:$0xff] }
   0xd   :  { %v72_v2 = vsel %vm71_vm0, %v67_v0, 0.0  ;;  %v75_v3 = vsel %vm71_vm0, %v68_v1, 0.0 }
   0xe   :  { %73 = vadd.xlane.f32.xlu0 %v72_v2 }
   0xf   :  { %25 = vsyncpa [#allocation3], 0  ;;  %v2231_v4 = vmov 32.0   ;;  %s2898_s26 = sld [smem:[#allocation7_spill]]  ;;  %v2087_v42 = vld [vmem:[%s2863_s14] ss:$0 sm:$0xff] }
  0x10   :  { %2109 = vrcp.f32 %v2231_v4  ;;  %v2088_v47 = vld [vmem:[%s2864_s15] ss:$0 sm:$0xff]  ;;  %s2899_s1 = sld [smem:[#allocation8_spill]]  ;;  %s2890_s15 = smov 72   ;;  %vm179_vm8 = vcmask 64512   ;;  %vm219_vm9 = vcmask 1043456  }
  0x11   :  { %s2233_s22 = smov 120   ;;  %s2234_s23 = smov 96   ;;  %vm423_vm10 = vcmask 130048   ;;  %vm425_vm11 = vcmask 195584  }
  0x12   :  { %s2886_s24 = smov 112   ;;  %s2236_s2 = smov 88  }
  0x13   :  { %s2237_s25 = smov 80   ;;  %s2888_s3 = smov 104  }
  0x14   :  { %s2900_s4 = sld [smem:[#allocation6_spill]]  ;;  %s2880_s29 = smov 64  }
  0x15   :  { %v2018_v21 = vld [vmem:[%s2898_s26 + $0x8] sm:$0xff]  ;;  %v2017_v23 = vld [vmem:[%s2898_s26] sm:$0xff]  ;;  %s2884_s30 = smov 56   ;;  %s2877_s21 = smov 48  }
  0x16   :  { %76 = vadd.xlane.f32.xlu0 %v75_v3  ;;  %v2110_v5 = vpop.eup %2109  ;;  %163 = vmatpush.bf16.msra.mxu0 %v2018_v21  ;;  %v2089_v52 = vld [vmem:[%s2899_s1] ss:$0 sm:$0xff]  ;;  %s2875_s27 = smov 40   ;;  %s2879_s28 = smov 16  }
  0x17   :  { %v79_v6 = vmul.f32 32.0, %v2110_v5  ;;  %vm83_vm1 = vweird.f32 %v2110_v5  ;;  %s2882_s0 = smov 24  }
  0x19   :  { %v80_v7 = vsub.f32 1.0, %v79_v6 }
  0x1a   :  { %164 = vmatpush.bf16.msra.mxu0 %v2017_v23 }
  0x1b   :  { %v81_v8 = vmul.f32 %v2110_v5, %v80_v7 }
  0x1d   :  { %v82_v9 = vadd.f32 %v2110_v5, %v81_v8 }
  0x1f   :  { %v2360_v10 = vsel %vm83_vm1, %v2110_v5, %v82_v9 }
  0x81   :  { %v74_v11 = vpop.xlane.xlu0 %73 }
  0x82   :  { %v85_v12 = vmul.f32 %v2360_v10, %v74_v11 }
  0x84   :  { %v87_v13 = vsub.f32 %v67_v0, %v85_v12 }
  0x86   :  { %v89_v14 = vmul.f32 %v87_v13, %v87_v13 }
  0x88   :  { %v91_v15 = vsel %vm71_vm0, %v89_v14, 0.0 }
  0x89   :  { %92 = vadd.xlane.f32.xlu1 %v91_v15  ;;  %v77_v16 = vpop.xlane.xlu0 %76 }
  0x8a   :  { %v86_v17 = vmul.f32 %v2360_v10, %v77_v16 }
  0x8c   :  { %v88_v18 = vsub.f32 %v68_v1, %v86_v17 }
  0x8e   :  { %v90_v19 = vmul.f32 %v88_v18, %v88_v18 }
  0x90   :  { %v94_v20 = vsel %vm71_vm0, %v90_v19, 0.0 }
  0x91   :  { %95 = vadd.xlane.f32.xlu1 %v94_v20 }
  0xfc   :  { %v93_v22 = vpop.xlane.xlu1 %92 }
  0xfd   :  { %v97_v24 = vmul.f32 %v93_v22, %v2360_v10  ;;  %v2441_v22 = vld [vmem:[%s2900_s4] ss:$0 sm:$0xff] }
  0xff   :  { %v99_v25 = vadd.f32 1e-12, %v97_v24 }
 0x101   :  { %2111 = vrsqrt.f32 %v99_v25  ;;  %vm107_vm3 = vweird.f32 %v99_v25 }
 0x104   :  { %v96_v26 = vpop.xlane.xlu1 %95 }
 0x105   :  { %v98_v27 = vmul.f32 %v96_v26, %v2360_v10 }
 0x107   :  { %v2112_v28 = vpop.eup %2111  ;;  %v100_v29 = vadd.f32 1e-12, %v98_v27 }
 0x108   :  { %v102_v30 = vmul.f32 %v2112_v28, %v99_v25  ;;  %vm108_vm2 = vweird.f32 %v2112_v28 }
 0x109   :  { %2113 = vrsqrt.f32 %v100_v29  ;;  %vm109_vm4 = vmor %vm107_vm3, %vm108_vm2  ;;  %vm117_vm6 = vweird.f32 %v100_v29  ;;  %vm866_vm3 = vcmask 523264  }
 0x10a   :  { %v103_v31 = vmul.f32 %v2112_v28, %v102_v30 }
 0x10c   :  { %v104_v32 = vmul.f32 0.5, %v103_v31 }
 0x10e   :  { %v105_v33 = vsub.f32 1.5, %v104_v32 }
 0x10f   :  { %v2114_v34 = vpop.eup %2113 }
 0x110   :  { %v106_v35 = vmul.f32 %v2112_v28, %v105_v33  ;;  %v112_v36 = vmul.f32 %v2114_v34, %v100_v29  ;;  %vm118_vm5 = vweird.f32 %v2114_v34 }
 0x111   :  { %vm119_vm7 = vmor %vm117_vm6, %vm118_vm5 }
 0x112   :  { %v113_v37 = vmul.f32 %v2114_v34, %v112_v36  ;;  %v110_v38 = vsel %vm109_vm4, %v2112_v28, %v106_v35 }
 0x113   :  { %v121_v41 = vmul.f32 %v110_v38, %v87_v13 }
 0x114   :  { %v114_v39 = vmul.f32 0.5, %v113_v37 }
 0x115   :  { %v126_v46 = vmul.f32 %v2087_v42, %v121_v41 }
 0x116   :  { %v115_v40 = vsub.f32 1.5, %v114_v39 }
 0x117   :  { %v2380_v49 = vadd.f32 %v2088_v47, %v126_v46 }
 0x118   :  { %v116_v43 = vmul.f32 %v2114_v34, %v115_v40 }
 0x11a   :  { %v120_v44 = vsel %vm119_vm7, %v2114_v34, %v116_v43 }
 0x11b   :  { %v122_v45 = vmul.f32 %v120_v44, %v88_v18 }
 0x11d   :  { %v127_v48 = vmul.f32 %v2087_v42, %v122_v45 }
 0x11f   :  { %v2382_v50 = vadd.f32 %v2088_v47, %v127_v48  ;;  %v2461_v48 = vld [vmem:[%s2900_s4 + $0x1] ss:$0 sm:$0xff]  ;;  %s2883_s4 = smov 8  }
 0x121   :  { %v137_v51 = vpack.c.bf16 %v2382_v50, %v2380_v49 }
 0x123   :  { %1859 = vmatmul.msk.bf16.vlgmr.msra.gmra.mxu0 %vm71_vm0, %v137_v51 }
 0x1a0   :  { %v166_v53 = vpop.f32.mrf.mxu0 }
 0x1a1   :  { %v167_v54 = vadd.f32 %v2089_v52, %v166_v53 }
 0x1a3   :  { %v171_v55 = vpack.c.bf16 %v167_v54, %v167_v54 }
 0x1a5   :  { %v175_v56 = vunpack.c.l.b16 %v171_v55 }
 0x1a7   :  { %v2390_v57 = vpack.c.b16 %v175_v56, %v175_v56 }
 0x1a8   :  { %v168_v58 = vpop.f32.mrf.mxu0 }
 0x1a9   :  { %v169_v59 = vadd.f32 %v2089_v52, %v168_v58  ;;  %354 = vrot.lane.b32.xlu1 %v2390_v57, %s2890_s15  ;;  %236 = vrot.lane.b32.xlu0 %v2390_v57, %s2233_s22 }
 0x1aa   :  { %177 = vrot.lane.b32.xlu2 %v2390_v57, %s2234_s23 }
 0x1ab   :  { %v172_v60 = vpack.c.bf16 %v169_v59, %v169_v59 }
 0x1ad   :  { %v429_v61 = vunpack.c.l.b16 %v172_v60 }
 0x1af   :  { %v2398_v62 = vpack.c.b16 %v429_v61, %v429_v61 }
 0x1b1   :  { %431 = vrot.lane.b32.xlu1 %v2398_v62, %s2234_s23  ;;  %294 = vrot.lane.b32.xlu0 %v2390_v57, %s2886_s24 }
 0x1b2   :  { %238 = vrot.lane.b32.xlu2 %v2390_v57, %s2236_s2 }
 0x1b9   :  { %548 = vrot.lane.b32.xlu1 %v2398_v62, %s2237_s25  ;;  %606 = vrot.lane.b32.xlu0 %v2398_v62, %s2890_s15 }
 0x1ba   :  { %352 = vrot.lane.b32.xlu2 %v2390_v57, %s2888_s3 }
 0x1c1   :  { %546 = vrot.lane.b32.xlu0 %v2398_v62, %s2886_s24  ;;  %s2903_s24 = smov 104  }
 0x1c2   :  { %296 = vrot.lane.b32.xlu2 %v2390_v57, %s2237_s25 }
 0x1ca   :  { %490 = vrot.lane.b32.xlu2 %v2398_v62, %s2236_s2 }
 0x1d2   :  { %488 = vrot.lane.b32.xlu2 %v2398_v62, %s2233_s22 }
 0x1da   :  { %604 = vrot.lane.b32.xlu2 %v2398_v62, %s2888_s3  ;;  %s2904_s3 = smov 112  }
 0x204   :  { %v178_v63 = vpop.permute.xlu2 %177 }
 0x205   :  { %v184_v0 = vsel %vm179_vm8, %v178_v63, 0 }
 0x206   :  { %193 = vmatpush.bf16.xpose.msra.mxu1 %v184_v0 }
 0x20c   :  { %v239_v1 = vpop.permute.xlu2 %238 }
 0x20d   :  { %1860 = vmatmul.msk.bf16.vlgmr.msra.gmra.mxu1 %vm179_vm8, %v171_v55  ;;  %v244_v2 = vsel %vm179_vm8, %v239_v1, 0 }
 0x20e   :  { %253 = vmatpush.bf16.xpose.msra.mxu3 %v244_v2 }
 0x214   :  { %v353_v3 = vpop.permute.xlu2 %352 }
 0x21b   :  { %v355_v4 = vpop.permute.xlu1 %354  ;;  %v237_v5 = vpop.permute.xlu0 %236 }
 0x21c   :  { %v297_v6 = vpop.permute.xlu2 %296  ;;  %1862 = vmatmul.msk.bf16.vlgmr.msra.gmra.mxu3 %vm179_vm8, %v237_v5  ;;  %v360_v7 = vsel %vm179_vm8, %v355_v4, 0 }
 0x21d   :  { %v302_v8 = vsel %vm179_vm8, %v297_v6, 0  ;;  %369 = vmatpush.bf16.xpose.msrb.mxu3 %v360_v7 }
 0x21e   :  { %311 = vmatpush.bf16.xpose.msrb.mxu0 %v302_v8 }
 0x223   :  { %v432_v9 = vpop.permute.xlu1 %431  ;;  %v295_v11 = vpop.permute.xlu0 %294 }
 0x224   :  { %v437_v12 = vsel %vm179_vm8, %v432_v9, 0  ;;  %v491_v13 = vpop.permute.xlu2 %490 }
 0x225   :  { %v496_v14 = vsel %vm179_vm8, %v491_v13, 0  ;;  %1864 = vmatmul.msk.bf16.vlgmr.msrb.gmra.mxu0 %vm179_vm8, %v295_v11 }
 0x226   :  { %446 = vmatpush.bf16.xpose.msra.mxu0 %v437_v12  ;;  %505 = vmatpush.bf16.xpose.msra.mxu3 %v496_v14 }
 0x22b   :  { %v549_v15 = vpop.permute.xlu1 %548  ;;  %v607_v16 = vpop.permute.xlu0 %606 }
 0x22c   :  { %v554_v17 = vsel %vm179_vm8, %v549_v15, 0  ;;  %v612_v18 = vsel %vm179_vm8, %v607_v16, 0  ;;  %1866 = vmatmul.msk.bf16.vlgmr.msrb.gmra.mxu3 %vm179_vm8, %v353_v3  ;;  %v489_v19 = vpop.permute.xlu2 %488 }
 0x22e   :  { %563 = vmatpush.bf16.xpose.msrb.mxu0 %v554_v17  ;;  %621 = vmatpush.bf16.xpose.msrb.mxu3 %v612_v18 }
 0x233   :  { %v547_v20 = vpop.permute.xlu0 %546 }
 0x234   :  { %v605_v21 = vpop.permute.xlu2 %604 }
 0x235   :  { %1868 = vmatmul.msk.bf16.vlgmr.msra.gmra.mxu0 %vm179_vm8, %v172_v60 }
 0x23c   :  { %1870 = vmatmul.msk.bf16.vlgmr.msra.gmra.mxu3 %vm179_vm8, %v489_v19 }
 0x245   :  { %1872 = vmatmul.msk.bf16.vlgmr.msrb.gmra.mxu0 %vm179_vm8, %v547_v20 }
 0x24c   :  { %1874 = vmatmul.msk.bf16.vlgmr.msrb.gmra.mxu3 %vm179_vm8, %v605_v21 }
 0x28a   :  { %v195_v23 = vpop.f32.mrf.mxu1 }
 0x28b   :  { %v199_v24 = vmul.f32 0.35355338, %v195_v23 }
 0x28d   :  { %v201_v25 = vadd.f32 %v2441_v22, %v199_v24 }
 0x28f   :  { %v202_v26 = vsel %vm179_vm8, %v201_v25, -inf }
 0x290   :  { %203 = vmax.xlane.f32.xlu2 %v202_v26 }
 0x292   :  { %v197_v27 = vpop.f32.mrf.mxu1 }
 0x29f   :  { %v255_v28 = vpop.f32.mrf.mxu3 }
 0x2a0   :  { %v259_v29 = vmul.f32 0.35355338, %v255_v28 }
 0x2a2   :  { %v313_v30 = vpop.f32.mrf.mxu0  ;;  %v260_v31 = vadd.f32 %v2441_v22, %v259_v29 }
 0x2a3   :  { %v317_v32 = vmul.f32 0.35355338, %v313_v30 }
 0x2a4   :  { %v261_v33 = vsel %vm179_vm8, %v260_v31, -inf }
 0x2a5   :  { %262 = vmax.xlane.f32.xlu1 %v261_v33  ;;  %v318_v34 = vadd.f32 %v2441_v22, %v317_v32 }
 0x2a7   :  { %v257_v35 = vpop.f32.mrf.mxu3  ;;  %v319_v36 = vsel %vm179_vm8, %v318_v34, -inf }
 0x2a8   :  { %320 = vmax.xlane.f32.xlu2 %v319_v36 }
 0x2aa   :  { %v315_v37 = vpop.f32.mrf.mxu0 }
 0x2af   :  { %v371_v38 = vpop.f32.mrf.mxu3 }
 0x2b0   :  { %v375_v39 = vmul.f32 0.35355338, %v371_v38 }
 0x2b2   :  { %v448_v40 = vpop.f32.mrf.mxu0  ;;  %v2450_v41 = vadd.f32 %v2441_v22, %v375_v39 }
 0x2b3   :  { %v452_v63 = vmul.f32 0.35355338, %v448_v40 }
 0x2b4   :  { %v377_v42 = vsel %vm179_vm8, %v2450_v41, -inf }
 0x2b5   :  { %378 = vmax.xlane.f32.xlu0 %v377_v42  ;;  %v454_v1 = vadd.f32 %v2461_v48, %v452_v63 }
 0x2b7   :  { %v373_v43 = vpop.f32.mrf.mxu3  ;;  %v455_v3 = vsel %vm179_vm8, %v454_v1, -inf }
 0x2ba   :  { %v450_v44 = vpop.f32.mrf.mxu0 }
 0x2be   :  { %214 = vrot.lane.b32.xlu1 %v2390_v57, %s2880_s29 }
 0x2bf   :  { %v507_v45 = vpop.f32.mrf.mxu3 }
 0x2c0   :  { %273 = vrot.lane.b32.xlu2 %v2390_v57, %s2884_s30  ;;  %v511_v61 = vmul.f32 0.35355338, %v507_v45 }
 0x2c2   :  { %v565_v46 = vpop.f32.mrf.mxu0  ;;  %v512_v0 = vadd.f32 %v2461_v48, %v511_v61 }
 0x2c3   :  { %v569_v47 = vmul.f32 0.35355338, %v565_v46 }
 0x2c4   :  { %v513_v2 = vsel %vm179_vm8, %v512_v0, -inf }
 0x2c5   :  { %v570_v51 = vadd.f32 %v2461_v48, %v569_v47 }
 0x2c7   :  { %v571_v52 = vsel %vm179_vm8, %v570_v51, -inf  ;;  %v509_v53 = vpop.f32.mrf.mxu3 }
 0x2c8   :  { %572 = vmax.xlane.f32.xlu0 %v571_v52 }
 0x2ca   :  { %v567_v54 = vpop.f32.mrf.mxu0 }
 0x2cf   :  { %v623_v55 = vpop.f32.mrf.mxu3 }
 0x2d0   :  { %v627_v56 = vmul.f32 0.35355338, %v623_v55 }
 0x2d2   :  { %v2466_v58 = vadd.f32 %v2461_v48, %v627_v56 }
 0x2d4   :  { %v629_v59 = vsel %vm179_vm8, %v2466_v58, -inf }
 0x2d5   :  { %630 = vmax.xlane.f32.xlu0 %v629_v59 }
 0x2d7   :  { %v625_v60 = vpop.f32.mrf.mxu3 }
 0x2e8   :  { %514 = vmax.xlane.f32.xlu1 %v513_v2 }
 0x2e9   :  { %456 = vmax.xlane.f32.xlu2 %v455_v3 }
 0x301   :  { %331 = vrot.lane.b32.xlu2 %v2390_v57, %s2877_s21 }
 0x303   :  { %v204_v4 = vpop.xlane.xlu2 %203 }
 0x304   :  { %v205_v5 = vsub.f32 %v201_v25, %v204_v4 }
 0x306   :  { %v206_v6 = vmul.f32 1.442695, %v205_v5 }
 0x308   :  { %2115 = vpow2.f32 %v206_v6 }
 0x30e   :  { %v2476_v7 = vpop.eup %2115 }
 0x30f   :  { %v208_v8 = vsel %vm179_vm8, %v2476_v7, 0.0 }
 0x310   :  { %209 = vadd.xlane.f32.xlu0 %v208_v8 }
 0x318   :  { %v263_v9 = vpop.xlane.xlu1 %262 }
 0x319   :  { %v264_v11 = vsub.f32 %v260_v31, %v263_v9 }
 0x31b   :  { %v265_v12 = vmul.f32 1.442695, %v264_v11  ;;  %v321_v13 = vpop.xlane.xlu2 %320 }
 0x31c   :  { %v322_v14 = vsub.f32 %v318_v34, %v321_v13 }
 0x31d   :  { %2117 = vpow2.f32 %v265_v12 }
 0x31e   :  { %v323_v15 = vmul.f32 1.442695, %v322_v14 }
 0x320   :  { %2119 = vpow2.f32 %v323_v15 }
 0x323   :  { %v2482_v16 = vpop.eup %2117  ;;  %v274_v20 = vpop.permute.xlu2 %273 }
 0x324   :  { %389 = vrot.lane.b32.xlu0 %v2390_v57, %s2875_s27  ;;  %v267_v19 = vsel %vm179_vm8, %v2482_v16, 0.0  ;;  %v279_v57 = vsel %vm219_vm9, %v274_v20, 0 }
 0x326   :  { %v2484_v17 = vpop.eup %2119 }
 0x327   :  { %v325_v18 = vsel %vm179_vm8, %v2484_v17, 0.0 }
 0x328   :  { %326 = vadd.xlane.f32.xlu1 %v325_v18  ;;  %v379_v24 = vpop.xlane.xlu0 %378 }
 0x329   :  { %v380_v33 = vsub.f32 %v2450_v41, %v379_v24 }
 0x32a   :  { %268 = vadd.xlane.f32.xlu2 %v267_v19 }
 0x32b   :  { %v381_v35 = vmul.f32 1.442695, %v380_v33 }
 0x330   :  { %v215_v21 = vpop.permute.xlu1 %214 }
 0x331   :  { %v221_v23 = vsel %vm219_vm9, %v215_v21, 0 }
 0x332   :  { %230 = vmatpush.bf16.msra.mxu2 %v221_v23 }
 0x336   :  { %288 = vmatpush.bf16.msrb.mxu2 %v279_v57 }
 0x33b   :  { %v573_v25 = vpop.xlane.xlu0 %572 }
 0x33c   :  { %v574_v26 = vsub.f32 %v570_v51, %v573_v25 }
 0x33e   :  { %v575_v27 = vmul.f32 1.442695, %v574_v26 }
 0x340   :  { %2121 = vpow2.f32 %v575_v27 }
 0x341   :  { %525 = vrot.lane.b32.xlu1 %v2398_v62, %s2884_s30  ;;  %s2909_s30 = smov 8  }
 0x342   :  { %467 = vrot.lane.b32.xlu2 %v2398_v62, %s2880_s29 }
 0x346   :  { %v2497_v38 = vpop.eup %2121 }
 0x347   :  { %v577_v45 = vsel %vm179_vm8, %v2497_v38, 0.0 }
 0x348   :  { %v631_v36 = vpop.xlane.xlu0 %630 }
 0x349   :  { %v632_v43 = vsub.f32 %v2466_v58, %v631_v36 }
 0x34b   :  { %v633_v46 = vmul.f32 1.442695, %v632_v43 }
 0x35b   :  { %v515_v28 = vpop.xlane.xlu1 %514 }
 0x35c   :  { %v516_v29 = vsub.f32 %v512_v0, %v515_v28  ;;  %v457_v30 = vpop.xlane.xlu2 %456 }
 0x35d   :  { %v458_v31 = vsub.f32 %v454_v1, %v457_v30 }
 0x35e   :  { %v517_v32 = vmul.f32 1.442695, %v516_v29 }
 0x35f   :  { %v459_v34 = vmul.f32 1.442695, %v458_v31 }
 0x360   :  { %2123 = vpow2.f32 %v517_v32 }
 0x361   :  { %2125 = vpow2.f32 %v459_v34 }
 0x362   :  { %2127 = vpow2.f32 %v381_v35 }
 0x363   :  { %2129 = vpow2.f32 %v633_v46 }
 0x364   :  { %v332_v37 = vpop.permute.xlu2 %331 }
 0x365   :  { %v337_v39 = vsel %vm219_vm9, %v332_v37, 0 }
 0x366   :  { %v2500_v40 = vpop.eup %2123  ;;  %346 = vmatpush.bf16.msrb.mxu1 %v337_v39 }
 0x367   :  { %v2126_v42 = vpop.eup %2125  ;;  %v519_v44 = vsel %vm179_vm8, %v2500_v40, 0.0 }
 0x368   :  { %v461_v41 = vsel %vm179_vm8, %v2126_v42, 0.0  ;;  %v2128_v47 = vpop.eup %2127 }
 0x369   :  { %462 = vadd.xlane.f32.xlu0 %v461_v41  ;;  %v383_v51 = vsel %vm179_vm8, %v2128_v47, 0.0  ;;  %v2509_v52 = vpop.eup %2129 }
 0x36a   :  { %v635_v53 = vsel %vm179_vm8, %v2509_v52, 0.0 }
 0x36b   :  { %520 = vadd.xlane.f32.xlu2 %v519_v44  ;;  %578 = vadd.xlane.f32.xlu1 %v577_v45 }
 0x371   :  { %384 = vadd.xlane.f32.xlu0 %v383_v51 }
 0x379   :  { %636 = vadd.xlane.f32.xlu0 %v635_v53 }
 0x383   :  { %583 = vrot.lane.b32.xlu2 %v2398_v62, %s2877_s21  ;;  %v210_v54 = vpop.xlane.xlu0 %209  ;;  %s2901_s21 = sld [smem:[#allocation9_spill]] }
 0x384   :  { %2131 = vrcp.f32 %v210_v54 }
 0x38a   :  { %v2132_v55 = vpop.eup %2131 }
 0x38b   :  { %v212_v56 = vmul.f32 %v2132_v55, %v2476_v7 }
 0x38d   :  { %641 = vrot.lane.b32.xlu0 %v2398_v62, %s2875_s27  ;;  %v213_v58 = vpack.c.bf16 %v212_v56, %v212_v56  ;;  %v2020_v56 = vld [vmem:[%s2901_s21 + $0x8] sm:$0xff] }
 0x38e   :  { %707 = vmatpush.bf16.msra.mxu0 %v2020_v56  ;;  %v2094_v56 = vld [vmem:[%s2856_s7] ss:$0 sm:$0xff] }
 0x38f   :  { %1861 = vmatmul.msk.bf16.vlgmr.msra.gmra.mxu2 %vm179_vm8, %v213_v58  ;;  %v2019_v58 = vld [vmem:[%s2901_s21] sm:$0xff] }
 0x392   :  { %708 = vmatpush.bf16.msra.mxu0 %v2019_v58 }
 0x396   :  { %v390_v59 = vpop.permute.xlu0 %389 }
 0x397   :  { %v395_v60 = vsel %vm219_vm9, %v390_v59, 0 }
 0x398   :  { %404 = vmatpush.bf16.msra.mxu2 %v395_v60 }
 0x39b   :  { %v327_v61 = vpop.xlane.xlu1 %326 }
 0x39c   :  { %2133 = vrcp.f32 %v327_v61 }
 0x39d   :  { %v269_v63 = vpop.xlane.xlu2 %268 }
 0x39e   :  { %2135 = vrcp.f32 %v269_v63 }
 0x3a2   :  { %v2134_v0 = vpop.eup %2133 }
 0x3a3   :  { %v329_v1 = vmul.f32 %v2134_v0, %v2484_v17 }
 0x3a4   :  { %v2136_v2 = vpop.eup %2135 }
 0x3a5   :  { %v271_v3 = vmul.f32 %v2136_v2, %v2482_v16  ;;  %v468_v4 = vpop.permute.xlu2 %467  ;;  %v330_v5 = vpack.c.bf16 %v329_v1, %v329_v1 }
 0x3a6   :  { %v473_v62 = vsel %vm219_vm9, %v468_v4, 0 }
 0x3a7   :  { %1865 = vmatmul.msk.bf16.vlgmr.msrb.gmra.mxu1 %vm179_vm8, %v330_v5  ;;  %v272_v6 = vpack.c.bf16 %v271_v3, %v271_v3 }
 0x3a8   :  { %482 = vmatpush.bf16.msra.mxu1 %v473_v62 }
 0x3a9   :  { %1863 = vmatmul.msk.bf16.vlgmr.msrb.gmra.mxu2 %vm179_vm8, %v272_v6 }
 0x3b3   :  { %v526_v7 = vpop.permute.xlu1 %525 }
 0x3b4   :  { %v531_v8 = vsel %vm219_vm9, %v526_v7, 0 }
 0x3b5   :  { %540 = vmatpush.bf16.msrb.mxu2 %v531_v8 }
 0x3dc   :  { %v463_v9 = vpop.xlane.xlu0 %462 }
 0x3dd   :  { %2137 = vrcp.f32 %v463_v9 }
 0x3de   :  { %v521_v11 = vpop.xlane.xlu2 %520  ;;  %v579_v16 = vpop.xlane.xlu1 %578 }
 0x3e3   :  { %v2138_v12 = vpop.eup %2137 }
 0x3e4   :  { %v465_v13 = vmul.f32 %v2138_v12, %v2126_v42  ;;  %v385_v14 = vpop.xlane.xlu0 %384  ;;  %v2092_v12 = vld [vmem:[%s2854_s5] ss:$0 sm:$0xff] }
 0x3e5   :  { %2139 = vrcp.f32 %v385_v14 }
 0x3e6   :  { %v466_v15 = vpack.c.bf16 %v465_v13, %v465_v13  ;;  %v584_v17 = vpop.permute.xlu2 %583  ;;  %2141 = vrcp.f32 %v579_v16 }
 0x3e7   :  { %v589_v18 = vsel %vm219_vm9, %v584_v17, 0  ;;  %2143 = vrcp.f32 %v521_v11 }
 0x3e8   :  { %1869 = vmatmul.msk.bf16.vlgmr.msra.gmra.mxu1 %vm179_vm8, %v466_v15 }
 0x3e9   :  { %598 = vmatpush.bf16.msrb.mxu1 %v589_v18 }
 0x3eb   :  { %v2140_v19 = vpop.eup %2139 }
 0x3ec   :  { %v387_v20 = vmul.f32 %v2140_v19, %v2128_v47  ;;  %v2142_v23 = vpop.eup %2141  ;;  %v637_v26 = vpop.xlane.xlu0 %636 }
 0x3ed   :  { %v581_v57 = vmul.f32 %v2142_v23, %v2497_v38  ;;  %v2144_v25 = vpop.eup %2143  ;;  %2145 = vrcp.f32 %v637_v26 }
 0x3ee   :  { %v388_v21 = vpack.c.bf16 %v387_v20, %v387_v20  ;;  %v523_v27 = vmul.f32 %v2144_v25, %v2500_v40 }
 0x3ef   :  { %v582_v24 = vpack.c.bf16 %v581_v57, %v581_v57 }
 0x3f0   :  { %1867 = vmatmul.msk.bf16.vlgmr.msra.gmra.mxu2 %vm179_vm8, %v388_v21  ;;  %v524_v28 = vpack.c.bf16 %v523_v27, %v523_v27 }
 0x3f3   :  { %v2146_v31 = vpop.eup %2145 }
 0x3f4   :  { %v639_v32 = vmul.f32 %v2146_v31, %v2509_v52 }
 0x3f6   :  { %v640_v33 = vpack.c.bf16 %v639_v32, %v639_v32 }
 0x3f8   :  { %1873 = vmatmul.msk.bf16.vlgmr.msrb.gmra.mxu1 %vm179_vm8, %v582_v24 }
 0x3ff   :  { %v642_v29 = vpop.permute.xlu0 %641 }
 0x400   :  { %v647_v30 = vsel %vm219_vm9, %v642_v29, 0  ;;  %1871 = vmatmul.msk.bf16.vlgmr.msrb.gmra.mxu2 %vm179_vm8, %v524_v28 }
 0x401   :  { %656 = vmatpush.bf16.msra.mxu2 %v647_v30 }
 0x410   :  { %1875 = vmatmul.msk.bf16.vlgmr.msra.gmra.mxu2 %vm179_vm8, %v640_v33  ;;  %v2021_v33 = vld [vmem:[%s2857_s8] sm:$0xff] }
 0x412   :  { %v232_v34 = vpop.f32.mrf.mxu2 }
 0x41a   :  { %v234_v35 = vpop.f32.mrf.mxu2 }
 0x424   :  { %v348_v36 = vpop.f32.mrf.mxu1 }
 0x42c   :  { %v290_v37 = vpop.f32.mrf.mxu2  ;;  %v350_v38 = vpop.f32.mrf.mxu1 }
 0x434   :  { %v292_v39 = vpop.f32.mrf.mxu2 }
 0x465   :  { %v484_v40 = vpop.f32.mrf.mxu1 }
 0x46d   :  { %v486_v42 = vpop.f32.mrf.mxu1 }
 0x473   :  { %v406_v43 = vpop.f32.mrf.mxu2 }
 0x475   :  { %v600_v41 = vpop.f32.mrf.mxu1 }
 0x476   :  { %v2057_v44 = vpack.i.bf16 %v600_v41, %v348_v36 }
 0x478   :  { %2058 = vrot.lane.b32.xlu2 %v2057_v44, %s2879_s28 }
 0x47b   :  { %v408_v45 = vpop.f32.mrf.mxu2 }
 0x47d   :  { %v602_v46 = vpop.f32.mrf.mxu1 }
 0x483   :  { %v542_v47 = vpop.f32.mrf.mxu2 }
 0x484   :  { %v2062_v51 = vpack.i.bf16 %v542_v47, %v290_v37 }
 0x486   :  { %2063 = vrot.lane.b32.xlu0 %v2062_v51, %s2883_s4  ;;  %s2910_s4 = smov 16  }
 0x48b   :  { %v544_v52 = vpop.f32.mrf.mxu2 }
 0x48c   :  { %v2093_v52 = vld [vmem:[%s2855_s6] ss:$0 sm:$0xff] }
 0x493   :  { %v658_v53 = vpop.f32.mrf.mxu2 }
 0x494   :  { %v2067_v54 = vpack.i.bf16 %v658_v53, %v406_v43 }
 0x496   :  { %2068 = vrot.lane.b32.xlu0 %v2067_v54, %s2882_s0  ;;  %s2911_s0 = smov 24  }
 0x49b   :  { %v660_v55 = vpop.f32.mrf.mxu2 }
 0x4d2   :  { %v2059_v63 = vpop.permute.xlu2 %2058 }
 0x4d3   :  { %v2061_v2 = vunpack.i.h.bf16 %v2059_v63  ;;  %v2060_v3 = vunpack.i.l.bf16 %v2059_v63 }
 0x4f8   :  { %v2064_v59 = vpop.permute.xlu0 %2063 }
 0x4f9   :  { %v2066_v60 = vunpack.i.h.bf16 %v2064_v59  ;;  %v2065_v61 = vunpack.i.l.bf16 %v2064_v59 }
 0x4fb   :  { %v674_v0 = vsel %vm179_vm8, %v484_v40, %v2066_v60  ;;  %v422_v1 = vsel %vm179_vm8, %v232_v34, %v2065_v61 }
 0x4fc   :  { %v424_v6 = vsel %vm423_vm10, %v422_v1, %v2060_v3  ;;  %v675_v7 = vsel %vm423_vm10, %v674_v0, %v2061_v2  ;;  %v2026_v1 = vld [vmem:[%s2859_s10 + $0x18] sm:$0xff]  ;;  %v2025_v2 = vld [vmem:[%s2859_s10 + $0x10] sm:$0xff]  ;;  %v2024_v3 = vld [vmem:[%s2859_s10 + $0x8] sm:$0xff] }
 0x4fd   :  { %874 = vmatpush.bf16.msra.mxu3 %v2026_v1 }
 0x501   :  { %875 = vmatpush.bf16.msra.mxu3 %v2025_v2 }
 0x505   :  { %876 = vmatpush.bf16.msra.mxu3 %v2024_v3 }
 0x508   :  { %v2069_v4 = vpop.permute.xlu0 %2068 }
 0x509   :  { %v2071_v5 = vunpack.i.h.bf16 %v2069_v4  ;;  %v2070_v62 = vunpack.i.l.bf16 %v2069_v4  ;;  %v2095_v4 = vld [vmem:[%s2858_s9] ss:$0 sm:$0xff] }
 0x50b   :  { %v426_v8 = vsel %vm425_vm11, %v424_v6, %v2070_v62  ;;  %v676_v9 = vsel %vm425_vm11, %v675_v7, %v2071_v5  ;;  %v2023_v62 = vld [vmem:[%s2859_s10] sm:$0xff] }
 0x50c   :  { %v681_v11 = vpack.c.bf16 %v676_v9, %v426_v8  ;;  %877 = vmatpush.bf16.msra.mxu3 %v2023_v62 }
 0x50e   :  { %1884 = vmatmul.msk.bf16.vlgmr.msra.gmra.mxu0 %vm71_vm0, %v681_v11 }
 0x58b   :  { %v710_v13 = vpop.f32.mrf.mxu0 }
 0x58c   :  { %v711_v14 = vadd.f32 %v2092_v12, %v710_v13 }
 0x58e   :  { %v715_v15 = vadd.f32 %v711_v14, %v2380_v49 }
 0x590   :  { %v719_v16 = vsel %vm71_vm0, %v715_v15, 0.0 }
 0x591   :  { %720 = vadd.xlane.f32.xlu2 %v719_v16 }
 0x593   :  { %v712_v17 = vpop.f32.mrf.mxu0 }
 0x594   :  { %v713_v18 = vadd.f32 %v2092_v12, %v712_v17 }
 0x596   :  { %v716_v19 = vadd.f32 %v713_v18, %v2382_v50  ;;  %v2022_v50 = vld [vmem:[%s2857_s8 + $0x8] sm:$0xff] }
 0x597   :  { %803 = vmatpush.bf16.msra.mxu1 %v2022_v50 }
 0x598   :  { %v722_v20 = vsel %vm71_vm0, %v716_v19, 0.0 }
 0x599   :  { %723 = vadd.xlane.f32.xlu0 %v722_v20 }
 0x59b   :  { %804 = vmatpush.bf16.msra.mxu1 %v2021_v33 }
 0x604   :  { %v721_v21 = vpop.xlane.xlu2 %720 }
 0x605   :  { %v725_v23 = vmul.f32 %v721_v21, %v2360_v10 }
 0x607   :  { %v727_v57 = vsub.f32 %v715_v15, %v725_v23 }
 0x609   :  { %v729_v24 = vmul.f32 %v727_v57, %v727_v57 }
 0x60b   :  { %v731_v25 = vsel %vm71_vm0, %v729_v24, 0.0 }
 0x60c   :  { %v724_v26 = vpop.xlane.xlu0 %723  ;;  %732 = vadd.xlane.f32.xlu1 %v731_v25 }
 0x60d   :  { %v726_v49 = vmul.f32 %v724_v26, %v2360_v10 }
 0x60f   :  { %v728_v27 = vsub.f32 %v716_v19, %v726_v49 }
 0x611   :  { %v730_v28 = vmul.f32 %v728_v27, %v728_v27 }
 0x613   :  { %v734_v29 = vsel %vm71_vm0, %v730_v28, 0.0  ;;  %v2096_v28 = vld [vmem:[%s2860_s11] ss:$0 sm:$0xff] }
 0x614   :  { %735 = vadd.xlane.f32.xlu1 %v734_v29 }
 0x67f   :  { %v733_v30 = vpop.xlane.xlu1 %732 }
 0x680   :  { %v737_v31 = vmul.f32 %v733_v30, %v2360_v10 }
 0x682   :  { %v739_v32 = vadd.f32 1e-12, %v737_v31 }
 0x684   :  { %2147 = vrsqrt.f32 %v739_v32  ;;  %vm747_vm13 = vweird.f32 %v739_v32 }
 0x687   :  { %v736_v34 = vpop.xlane.xlu1 %735 }
 0x688   :  { %v738_v35 = vmul.f32 %v736_v34, %v2360_v10 }
 0x68a   :  { %v2148_v36 = vpop.eup %2147  ;;  %v740_v37 = vadd.f32 1e-12, %v738_v35 }
 0x68b   :  { %v742_v38 = vmul.f32 %v2148_v36, %v739_v32  ;;  %vm748_vm12 = vweird.f32 %v2148_v36 }
 0x68c   :  { %2149 = vrsqrt.f32 %v740_v37  ;;  %vm749_vm14 = vmor %vm747_vm13, %vm748_vm12  ;;  %vm757_vm1 = vweird.f32 %v740_v37 }
 0x68d   :  { %v743_v39 = vmul.f32 %v2148_v36, %v742_v38 }
 0x68f   :  { %v744_v40 = vmul.f32 0.5, %v743_v39 }
 0x691   :  { %v745_v42 = vsub.f32 1.5, %v744_v40 }
 0x692   :  { %v2150_v43 = vpop.eup %2149 }
 0x693   :  { %v746_v41 = vmul.f32 %v2148_v36, %v745_v42  ;;  %v752_v44 = vmul.f32 %v2150_v43, %v740_v37  ;;  %vm758_vm15 = vweird.f32 %v2150_v43 }
 0x694   :  { %vm759_vm2 = vmor %vm757_vm1, %vm758_vm15 }
 0x695   :  { %v753_v45 = vmul.f32 %v2150_v43, %v752_v44  ;;  %v750_v46 = vsel %vm749_vm14, %v2148_v36, %v746_v41 }
 0x696   :  { %v761_v53 = vmul.f32 %v750_v46, %v727_v57  ;;  %v2028_v46 = vld [vmem:[%s2898_s26 + $0x18] sm:$0xff] }
 0x697   :  { %v754_v47 = vmul.f32 0.5, %v753_v45  ;;  %974 = vmatpush.bf16.msrb.mxu2 %v2028_v46 }
 0x698   :  { %v766_v58 = vmul.f32 %v2093_v52, %v761_v53  ;;  %v2027_v53 = vld [vmem:[%s2898_s26 + $0x10] sm:$0xff] }
 0x699   :  { %v755_v51 = vsub.f32 1.5, %v754_v47 }
 0x69a   :  { %v771_v61 = vadd.f32 %v2094_v56, %v766_v58 }
 0x69b   :  { %v756_v54 = vmul.f32 %v2150_v43, %v755_v51  ;;  %975 = vmatpush.bf16.msrb.mxu2 %v2027_v53 }
 0x69d   :  { %v760_v55 = vsel %vm759_vm2, %v2150_v43, %v756_v54 }
 0x69e   :  { %v762_v59 = vmul.f32 %v760_v55, %v728_v27 }
 0x6a0   :  { %v767_v60 = vmul.f32 %v2093_v52, %v762_v59 }
 0x6a2   :  { %v772_v63 = vadd.f32 %v2094_v56, %v767_v60 }
 0x6a4   :  { %v777_v0 = vpack.c.bf16 %v772_v63, %v771_v61 }
 0x6a6   :  { %1893 = vmatmul.msk.bf16.vlgmr.msra.gmra.mxu1 %vm71_vm0, %v777_v0 }
 0x723   :  { %v806_v5 = vpop.f32.mrf.mxu1 }
 0x724   :  { %v807_v6 = vadd.f32 %v2095_v4, %v806_v5 }
 0x726   :  { %v811_v7 = vmul.f32 %v807_v6, %v807_v6 }
 0x728   :  { %v813_v8 = vmul.f32 %v811_v7, %v807_v6 }
 0x72a   :  { %v815_v9 = vmul.f32 0.044715, %v813_v8 }
 0x72b   :  { %v808_v11 = vpop.f32.mrf.mxu1 }
 0x72c   :  { %v817_v12 = vadd.f32 %v815_v9, %v807_v6  ;;  %v809_v13 = vadd.f32 %v2095_v4, %v808_v11  ;;  %v2098_v11 = vld [vmem:[%s2862_s13] ss:$0 sm:$0xff] }
 0x72e   :  { %v819_v14 = vmul.f32 0.7978846, %v817_v12  ;;  %v812_v15 = vmul.f32 %v809_v13, %v809_v13 }
 0x730   :  { %v814_v16 = vmul.f32 %v812_v15, %v809_v13  ;;  %2151 = vtanh.f32 %v819_v14 }
 0x732   :  { %v816_v17 = vmul.f32 0.044715, %v814_v16 }
 0x734   :  { %v818_v18 = vadd.f32 %v816_v17, %v809_v13 }
 0x736   :  { %v820_v19 = vmul.f32 0.7978846, %v818_v18  ;;  %v2152_v20 = vpop.eup %2151  ;;  %v2099_v18 = vld [vmem:[%s2899_s1 + $0x1] ss:$0 sm:$0xff]  ;;  %s2902_s1 = smov 72  }
 0x737   :  { %v823_v21 = vadd.f32 1.0, %v2152_v20 }
 0x738   :  { %2153 = vtanh.f32 %v820_v19 }
 0x739   :  { %v825_v57 = vmul.f32 0.5, %v823_v21 }
 0x73b   :  { %v827_v26 = vmul.f32 %v825_v57, %v807_v6  ;;  %v2097_v6 = vld [vmem:[%s2861_s12] ss:$0 sm:$0xff] }
 0x73e   :  { %v2154_v23 = vpop.eup %2153 }
 0x73f   :  { %v824_v24 = vadd.f32 1.0, %v2154_v23 }
 0x741   :  { %v826_v25 = vmul.f32 0.5, %v824_v24 }
 0x743   :  { %v828_v49 = vmul.f32 %v826_v25, %v809_v13 }
 0x745   :  { %v837_v27 = vpack.c.bf16 %v828_v49, %v827_v26 }
 0x747   :  { %1910 = vmatmul.msk.bf16.vlgmr.msra.gmra.mxu3 %vm866_vm3, %v837_v27 }
 0x7ca   :  { %v879_v29 = vpop.f32.mrf.mxu3 }
 0x7cb   :  { %v880_v50 = vadd.f32 %v2096_v28, %v879_v29 }
 0x7cd   :  { %v884_v30 = vadd.f32 %v880_v50, %v771_v61 }
 0x7cf   :  { %v888_v31 = vsel %vm71_vm0, %v884_v30, 0.0 }
 0x7d0   :  { %889 = vadd.xlane.f32.xlu1 %v888_v31 }
 0x7d2   :  { %v881_v32 = vpop.f32.mrf.mxu3 }
 0x7d3   :  { %v882_v33 = vadd.f32 %v2096_v28, %v881_v32 }
 0x7d5   :  { %v885_v34 = vadd.f32 %v882_v33, %v772_v63 }
 0x7d7   :  { %v891_v35 = vsel %vm71_vm0, %v885_v34, 0.0 }
 0x7d8   :  { %892 = vadd.xlane.f32.xlu1 %v891_v35 }
 0x843   :  { %v890_v36 = vpop.xlane.xlu1 %889 }
 0x844   :  { %v894_v37 = vmul.f32 %v890_v36, %v2360_v10 }
 0x846   :  { %v896_v38 = vsub.f32 %v884_v30, %v894_v37 }
 0x848   :  { %v898_v39 = vmul.f32 %v896_v38, %v896_v38 }
 0x84a   :  { %v900_v40 = vsel %vm71_vm0, %v898_v39, 0.0 }
 0x84b   :  { %901 = vadd.xlane.f32.xlu1 %v900_v40  ;;  %v893_v42 = vpop.xlane.xlu1 %892 }
 0x84c   :  { %v895_v43 = vmul.f32 %v893_v42, %v2360_v10 }
 0x84e   :  { %v897_v41 = vsub.f32 %v885_v34, %v895_v43 }
 0x850   :  { %v899_v44 = vmul.f32 %v897_v41, %v897_v41 }
 0x852   :  { %v903_v45 = vsel %vm71_vm0, %v899_v44, 0.0 }
 0x853   :  { %904 = vadd.xlane.f32.xlu2 %v903_v45 }
 0x8be   :  { %v902_v47 = vpop.xlane.xlu1 %901 }
 0x8bf   :  { %v906_v51 = vmul.f32 %v902_v47, %v2360_v10 }
 0x8c1   :  { %v908_v52 = vadd.f32 1e-12, %v906_v51 }
 0x8c3   :  { %2155 = vrsqrt.f32 %v908_v52  ;;  %vm916_vm5 = vweird.f32 %v908_v52 }
 0x8c6   :  { %v905_v54 = vpop.xlane.xlu2 %904 }
 0x8c7   :  { %v907_v55 = vmul.f32 %v905_v54, %v2360_v10 }
 0x8c9   :  { %v2156_v56 = vpop.eup %2155  ;;  %v909_v58 = vadd.f32 1e-12, %v907_v55 }
 0x8ca   :  { %v911_v59 = vmul.f32 %v2156_v56, %v908_v52  ;;  %vm917_vm4 = vweird.f32 %v2156_v56 }
 0x8cb   :  { %2157 = vrsqrt.f32 %v909_v58  ;;  %vm918_vm6 = vmor %vm916_vm5, %vm917_vm4  ;;  %vm926_vm12 = vweird.f32 %v909_v58 }
 0x8cc   :  { %v912_v60 = vmul.f32 %v2156_v56, %v911_v59 }
 0x8ce   :  { %v913_v61 = vmul.f32 0.5, %v912_v60 }
 0x8d0   :  { %v914_v63 = vsub.f32 1.5, %v913_v61 }
 0x8d1   :  { %v2158_v0 = vpop.eup %2157 }
 0x8d2   :  { %v915_v1 = vmul.f32 %v2156_v56, %v914_v63  ;;  %v921_v2 = vmul.f32 %v2158_v0, %v909_v58  ;;  %vm927_vm7 = vweird.f32 %v2158_v0 }
 0x8d3   :  { %vm928_vm13 = vmor %vm926_vm12, %vm927_vm7  ;;  %vm1757_vm7 = vcmask 1040384  }
 0x8d4   :  { %v922_v3 = vmul.f32 %v2158_v0, %v921_v2  ;;  %v919_v4 = vsel %vm918_vm6, %v2156_v56, %v915_v1 }
 0x8d5   :  { %v930_v7 = vmul.f32 %v919_v4, %v896_v38 }
 0x8d6   :  { %v923_v5 = vmul.f32 0.5, %v922_v3 }
 0x8d7   :  { %v935_v12 = vmul.f32 %v2097_v6, %v930_v7 }
 0x8d8   :  { %v924_v62 = vsub.f32 1.5, %v923_v5 }
 0x8d9   :  { %v2617_v15 = vadd.f32 %v2098_v11, %v935_v12 }
 0x8da   :  { %v925_v8 = vmul.f32 %v2158_v0, %v924_v62 }
 0x8dc   :  { %v929_v9 = vsel %vm928_vm13, %v2158_v0, %v925_v8 }
 0x8dd   :  { %v931_v13 = vmul.f32 %v929_v9, %v897_v41 }
 0x8df   :  { %v936_v14 = vmul.f32 %v2097_v6, %v931_v13 }
 0x8e1   :  { %v2619_v16 = vadd.f32 %v2098_v11, %v936_v14 }
 0x8e3   :  { %v947_v17 = vpack.c.bf16 %v2619_v16, %v2617_v15 }
 0x8e5   :  { %1924 = vmatmul.msk.bf16.vlgmr.msrb.gmra.mxu2 %vm71_vm0, %v947_v17 }
 0x968   :  { %v977_v19 = vpop.f32.mrf.mxu2 }
 0x969   :  { %v978_v20 = vadd.f32 %v2099_v18, %v977_v19 }
 0x96b   :  { %v982_v21 = vpack.c.bf16 %v978_v20, %v978_v20 }
 0x96d   :  { %v985_v23 = vunpack.c.l.b16 %v982_v21 }
 0x96f   :  { %v2627_v57 = vpack.c.b16 %v985_v23, %v985_v23 }
 0x970   :  { %v979_v24 = vpop.f32.mrf.mxu2 }
 0x971   :  { %987 = vrot.lane.b32.xlu2 %v2627_v57, %s2234_s23  ;;  %1043 = vrot.lane.b32.xlu0 %v2627_v57, %s2233_s22  ;;  %v980_v25 = vadd.f32 %v2099_v18, %v979_v24 }
 0x972   :  { %1045 = vrot.lane.b32.xlu1 %v2627_v57, %s2236_s2 }
 0x973   :  { %v983_v26 = vpack.c.bf16 %v980_v25, %v980_v25 }
 0x975   :  { %v1233_v49 = vunpack.c.l.b16 %v983_v26 }
 0x977   :  { %v2641_v27 = vpack.c.b16 %v1233_v49, %v1233_v49 }
 0x979   :  { %1103 = vrot.lane.b32.xlu2 %v2627_v57, %s2237_s25  ;;  %1161 = vrot.lane.b32.xlu0 %v2627_v57, %s2902_s1 }
 0x97a   :  { %1159 = vrot.lane.b32.xlu1 %v2627_v57, %s2903_s24 }
 0x981   :  { %1291 = vrot.lane.b32.xlu2 %v2641_v27, %s2233_s22  ;;  %1293 = vrot.lane.b32.xlu0 %v2641_v27, %s2236_s2  ;;  %s2905_s22 = smov 56   ;;  %s2907_s2 = smov 48  }
 0x982   :  { %1101 = vrot.lane.b32.xlu1 %v2627_v57, %s2904_s3 }
 0x989   :  { %1407 = vrot.lane.b32.xlu2 %v2641_v27, %s2903_s24  ;;  %1235 = vrot.lane.b32.xlu0 %v2641_v27, %s2234_s23  ;;  %s2906_s23 = smov 64  }
 0x98a   :  { %1409 = vrot.lane.b32.xlu1 %v2641_v27, %s2902_s1 }
 0x991   :  { %1351 = vrot.lane.b32.xlu0 %v2641_v27, %s2237_s25  ;;  %s2908_s25 = smov 40  }
 0x992   :  { %1349 = vrot.lane.b32.xlu1 %v2641_v27, %s2904_s3 }
 0x999   :  { %1080 = vrot.lane.b32.xlu0 %v2627_v57, %s2905_s22 }
 0x9cb   :  { %v988_v28 = vpop.permute.xlu2 %987 }
 0x9cc   :  { %v993_v29 = vsel %vm179_vm8, %v988_v28, 0 }
 0x9cd   :  { %1002 = vmatpush.bf16.xpose.msrb.mxu0 %v993_v29 }
 0x9d3   :  { %v1104_v50 = vpop.permute.xlu2 %1103 }
 0x9d4   :  { %v1109_v30 = vsel %vm179_vm8, %v1104_v50, 0  ;;  %1925 = vmatmul.msk.bf16.vlgmr.msrb.gmra.mxu0 %vm179_vm8, %v982_v21 }
 0x9d5   :  { %1118 = vmatpush.bf16.xpose.msra.mxu0 %v1109_v30 }
 0x9db   :  { %v1292_v47 = vpop.permute.xlu2 %1291 }
 0x9e3   :  { %v1044_v31 = vpop.permute.xlu0 %1043  ;;  %v1408_v53 = vpop.permute.xlu2 %1407 }
 0x9e4   :  { %v1046_v32 = vpop.permute.xlu1 %1045 }
 0x9e5   :  { %v1051_v33 = vsel %vm179_vm8, %v1046_v32, 0 }
 0x9e6   :  { %1060 = vmatpush.bf16.xpose.msrb.mxu3 %v1051_v33 }
 0x9eb   :  { %v1162_v34 = vpop.permute.xlu0 %1161 }
 0x9ec   :  { %v1167_v35 = vsel %vm179_vm8, %v1162_v34, 0  ;;  %v1160_v36 = vpop.permute.xlu1 %1159 }
 0x9ed   :  { %1927 = vmatmul.msk.bf16.vlgmr.msrb.gmra.mxu3 %vm179_vm8, %v1044_v31 }
 0x9ee   :  { %1176 = vmatpush.bf16.xpose.msra.mxu3 %v1167_v35 }
 0x9f3   :  { %v1294_v37 = vpop.permute.xlu0 %1293 }
 0x9f4   :  { %v1299_v38 = vsel %vm179_vm8, %v1294_v37, 0  ;;  %v1102_v39 = vpop.permute.xlu1 %1101 }
 0x9f5   :  { %1929 = vmatmul.msk.bf16.vlgmr.msra.gmra.mxu0 %vm179_vm8, %v1102_v39 }
 0x9f6   :  { %1308 = vmatpush.bf16.xpose.msrb.mxu3 %v1299_v38 }
 0x9fb   :  { %v1236_v40 = vpop.permute.xlu0 %1235 }
 0x9fc   :  { %v1241_v42 = vsel %vm179_vm8, %v1236_v40, 0  ;;  %v1410_v43 = vpop.permute.xlu1 %1409 }
 0x9fd   :  { %v1415_v41 = vsel %vm179_vm8, %v1410_v43, 0  ;;  %1931 = vmatmul.msk.bf16.vlgmr.msra.gmra.mxu3 %vm179_vm8, %v1160_v36  ;;  %1250 = vmatpush.bf16.xpose.msrb.mxu0 %v1241_v42 }
 0x9fe   :  { %1424 = vmatpush.bf16.xpose.msra.mxu3 %v1415_v41 }
 0xa03   :  { %v1352_v44 = vpop.permute.xlu0 %1351 }
 0xa04   :  { %v1357_v45 = vsel %vm179_vm8, %v1352_v44, 0  ;;  %v1350_v52 = vpop.permute.xlu1 %1349 }
 0xa05   :  { %1933 = vmatmul.msk.bf16.vlgmr.msrb.gmra.mxu0 %vm179_vm8, %v983_v26 }
 0xa06   :  { %1366 = vmatpush.bf16.xpose.msra.mxu0 %v1357_v45 }
 0xa0b   :  { %v1081_v46 = vpop.permute.xlu0 %1080 }
 0xa0c   :  { %v1086_v51 = vsel %vm219_vm9, %v1081_v46, 0 }
 0xa0d   :  { %1935 = vmatmul.msk.bf16.vlgmr.msrb.gmra.mxu3 %vm179_vm8, %v1292_v47  ;;  %1095 = vmatpush.bf16.msra.mxu2 %v1086_v51 }
 0xa15   :  { %1937 = vmatmul.msk.bf16.vlgmr.msra.gmra.mxu0 %vm179_vm8, %v1350_v52 }
 0xa1d   :  { %1939 = vmatmul.msk.bf16.vlgmr.msra.gmra.mxu3 %vm179_vm8, %v1408_v53 }
 0xa51   :  { %v1004_v54 = vpop.f32.mrf.mxu0 }
 0xa52   :  { %v1008_v55 = vmul.f32 0.35355338, %v1004_v54 }
 0xa54   :  { %v1009_v56 = vadd.f32 %v2441_v22, %v1008_v55 }
 0xa56   :  { %v1010_v58 = vsel %vm179_vm8, %v1009_v56, -inf }
 0xa57   :  { %1011 = vmax.xlane.f32.xlu0 %v1010_v58 }
 0xa59   :  { %v1006_v59 = vpop.f32.mrf.mxu0 }
 0xa70   :  { %v1062_v60 = vpop.f32.mrf.mxu3 }
 0xa71   :  { %v1066_v61 = vmul.f32 0.35355338, %v1062_v60 }
 0xa72   :  { %v1120_v63 = vpop.f32.mrf.mxu0 }
 0xa73   :  { %v1067_v0 = vadd.f32 %v2441_v22, %v1066_v61  ;;  %v1124_v1 = vmul.f32 0.35355338, %v1120_v63 }
 0xa75   :  { %v1068_v2 = vsel %vm179_vm8, %v1067_v0, -inf  ;;  %v1125_v4 = vadd.f32 %v2441_v22, %v1124_v1 }
 0xa76   :  { %1069 = vmax.xlane.f32.xlu2 %v1068_v2 }
 0xa77   :  { %v1126_v62 = vsel %vm179_vm8, %v1125_v4, -inf }
 0xa78   :  { %v1064_v3 = vpop.f32.mrf.mxu3 }
 0xa7a   :  { %v1122_v5 = vpop.f32.mrf.mxu0 }
 0xa7e   :  { %1127 = vmax.xlane.f32.xlu2 %v1126_v62 }
 0xa80   :  { %v1178_v6 = vpop.f32.mrf.mxu3 }
 0xa81   :  { %v1182_v7 = vmul.f32 0.35355338, %v1178_v6 }
 0xa82   :  { %v1252_v8 = vpop.f32.mrf.mxu0 }
 0xa83   :  { %v1183_v9 = vadd.f32 %v2441_v22, %v1182_v7  ;;  %v1256_v11 = vmul.f32 0.35355338, %v1252_v8 }
 0xa85   :  { %v1184_v12 = vsel %vm179_vm8, %v1183_v9, -inf  ;;  %v1257_v14 = vadd.f32 %v2461_v48, %v1256_v11 }
 0xa86   :  { %1185 = vmax.xlane.f32.xlu1 %v1184_v12 }
 0xa87   :  { %v1258_v18 = vsel %vm179_vm8, %v1257_v14, -inf }
 0xa88   :  { %v1180_v13 = vpop.f32.mrf.mxu3 }
 0xa8a   :  { %v1254_v17 = vpop.f32.mrf.mxu0 }
 0xa8e   :  { %1259 = vmax.xlane.f32.xlu1 %v1258_v18 }
 0xa90   :  { %v1310_v19 = vpop.f32.mrf.mxu3 }
 0xa91   :  { %v1314_v20 = vmul.f32 0.35355338, %v1310_v19 }
 0xa92   :  { %v1368_v21 = vpop.f32.mrf.mxu0 }
 0xa93   :  { %v1372_v23 = vmul.f32 0.35355338, %v1368_v21  ;;  %v1315_v24 = vadd.f32 %v2461_v48, %v1314_v20 }
 0xa95   :  { %v1316_v25 = vsel %vm179_vm8, %v1315_v24, -inf  ;;  %v1373_v22 = vadd.f32 %v2461_v48, %v1372_v23 }
 0xa96   :  { %1317 = vmax.xlane.f32.xlu0 %v1316_v25 }
 0xa97   :  { %v1374_v26 = vsel %vm179_vm8, %v1373_v22, -inf }
 0xa98   :  { %v1312_v49 = vpop.f32.mrf.mxu3  ;;  %1375 = vmax.xlane.f32.xlu1 %v1374_v26 }
 0xa9a   :  { %v1370_v28 = vpop.f32.mrf.mxu0 }
 0xaa0   :  { %v1426_v29 = vpop.f32.mrf.mxu3 }
 0xaa1   :  { %v1430_v50 = vmul.f32 0.35355338, %v1426_v29 }
 0xaa3   :  { %v2693_v30 = vadd.f32 %v2461_v48, %v1430_v50 }
 0xaa5   :  { %v1432_v31 = vsel %vm179_vm8, %v2693_v30, -inf }
 0xaa6   :  { %1433 = vmax.xlane.f32.xlu2 %v1432_v31 }
 0xaa8   :  { %v1428_v32 = vpop.f32.mrf.mxu3 }
 0xab1   :  { %1022 = vrot.lane.b32.xlu1 %v2627_v57, %s2906_s23 }
 0xaca   :  { %v1012_v33 = vpop.xlane.xlu0 %1011 }
 0xacb   :  { %v1013_v34 = vsub.f32 %v1009_v56, %v1012_v33 }
 0xacd   :  { %v1014_v35 = vmul.f32 1.442695, %v1013_v34 }
 0xacf   :  { %2159 = vpow2.f32 %v1014_v35 }
 0xad5   :  { %v2160_v36 = vpop.eup %2159 }
 0xad6   :  { %v1016_v37 = vsel %vm179_vm8, %v2160_v36, 0.0 }
 0xad7   :  { %1017 = vadd.xlane.f32.xlu2 %v1016_v37 }
 0xae9   :  { %v1070_v38 = vpop.xlane.xlu2 %1069 }
 0xaea   :  { %v1071_v39 = vsub.f32 %v1067_v0, %v1070_v38 }
 0xaec   :  { %v1072_v48 = vmul.f32 1.442695, %v1071_v39 }
 0xaee   :  { %2161 = vpow2.f32 %v1072_v48 }
 0xaef   :  { %1138 = vrot.lane.b32.xlu2 %v2627_v57, %s2907_s2 }
 0xaf1   :  { %v1128_v46 = vpop.xlane.xlu2 %1127 }
 0xaf2   :  { %v1129_v52 = vsub.f32 %v1125_v4, %v1128_v46 }
 0xaf4   :  { %v2702_v40 = vpop.eup %2161  ;;  %v1130_v53 = vmul.f32 1.442695, %v1129_v52 }
 0xaf5   :  { %v1074_v42 = vsel %vm179_vm8, %v2702_v40, 0.0 }
 0xaf6   :  { %1075 = vadd.xlane.f32.xlu0 %v1074_v42 }
 0xaf7   :  { %1328 = vrot.lane.b32.xlu2 %v2641_v27, %s2905_s22 }
 0xaf9   :  { %v1186_v43 = vpop.xlane.xlu1 %1185 }
 0xafa   :  { %v1187_v54 = vsub.f32 %v1183_v9, %v1186_v43 }
 0xafc   :  { %v1188_v55 = vmul.f32 1.442695, %v1187_v54 }
 0xb01   :  { %v1260_v41 = vpop.xlane.xlu1 %1259 }
 0xb02   :  { %v1261_v44 = vsub.f32 %v1257_v14, %v1260_v41 }
 0xb04   :  { %v1262_v45 = vmul.f32 1.442695, %v1261_v44 }
 0xb06   :  { %2163 = vpow2.f32 %v1262_v45 }
 0xb07   :  { %2165 = vpow2.f32 %v1130_v53 }
 0xb08   :  { %2167 = vpow2.f32 %v1188_v55 }
 0xb09   :  { %v1318_v59 = vpop.xlane.xlu0 %1317 }
 0xb0a   :  { %1196 = vrot.lane.b32.xlu0 %v2627_v57, %s2908_s25  ;;  %v1319_v57 = vsub.f32 %v1315_v24, %v1318_v59 }
 0xb0b   :  { %v1376_v56 = vpop.xlane.xlu1 %1375 }
 0xb0c   :  { %v2710_v47 = vpop.eup %2163  ;;  %v1320_v1 = vmul.f32 1.442695, %v1319_v57  ;;  %v1377_v3 = vsub.f32 %v1373_v22, %v1376_v56 }
 0xb0d   :  { %v1264_v51 = vsel %vm179_vm8, %v2710_v47, 0.0  ;;  %v2166_v58 = vpop.eup %2165 }
 0xb0e   :  { %1265 = vadd.xlane.f32.xlu1 %v1264_v51  ;;  %v1132_v60 = vsel %vm179_vm8, %v2166_v58, 0.0  ;;  %v2168_v63 = vpop.eup %2167  ;;  %2169 = vpow2.f32 %v1320_v1  ;;  %v1378_v4 = vmul.f32 1.442695, %v1377_v3 }
 0xb0f   :  { %v1190_v2 = vsel %vm179_vm8, %v2168_v63, 0.0 }
 0xb10   :  { %2171 = vpow2.f32 %v1378_v4 }
 0xb14   :  { %v2719_v5 = vpop.eup %2169 }
 0xb15   :  { %v1322_v62 = vsel %vm179_vm8, %v2719_v5, 0.0 }
 0xb16   :  { %v2723_v6 = vpop.eup %2171 }
 0xb17   :  { %v1380_v7 = vsel %vm179_vm8, %v2723_v6, 0.0 }
 0xb19   :  { %v1434_v8 = vpop.xlane.xlu2 %1433 }
 0xb1a   :  { %v1435_v18 = vsub.f32 %v2693_v30, %v1434_v8 }
 0xb1c   :  { %v1436_v19 = vmul.f32 1.442695, %v1435_v18  ;;  %v2030_v18 = vld [vmem:[%s2901_s21 + $0x18] sm:$0xff] }
 0xb1d   :  { %1512 = vmatpush.bf16.msrb.mxu0 %v2030_v18 }
 0xb20   :  { %1133 = vadd.xlane.f32.xlu2 %v1132_v60 }
 0xb23   :  { %v1023_v61 = vpop.permute.xlu1 %1022 }
 0xb24   :  { %v1028_v0 = vsel %vm219_vm9, %v1023_v61, 0 }
 0xb25   :  { %1037 = vmatpush.bf16.msrb.mxu1 %v1028_v0 }
 0xb27   :  { %1444 = vrot.lane.b32.xlu1 %v2641_v27, %s2908_s25  ;;  %s2246_s25 = smov [#allocation2]  }
 0xb28   :  { %1191 = vadd.xlane.f32.xlu2 %v1190_v2 }
 0xb34   :  { %1323 = vadd.xlane.f32.xlu0 %v1322_v62 }
 0xb3c   :  { %1381 = vadd.xlane.f32.xlu0 %v1380_v7 }
 0xb40   :  { %1270 = vrot.lane.b32.xlu2 %v2641_v27, %s2906_s23 }
 0xb4a   :  { %v1018_v9 = vpop.xlane.xlu2 %1017 }
 0xb4b   :  { %2173 = vrcp.f32 %v1018_v9 }
 0xb4c   :  { %2175 = vpow2.f32 %v1436_v19  ;;  %v2029_v19 = vld [vmem:[%s2901_s21 + $0x10] sm:$0xff] }
 0xb4d   :  { %1513 = vmatpush.bf16.msrb.mxu0 %v2029_v19 }
 0xb50   :  { %1386 = vrot.lane.b32.xlu0 %v2641_v27, %s2907_s2 }
 0xb51   :  { %v2174_v11 = vpop.eup %2173 }
 0xb52   :  { %v1020_v12 = vmul.f32 %v2174_v11, %v2160_v36  ;;  %v1139_v13 = vpop.permute.xlu2 %1138  ;;  %v2176_v20 = vpop.eup %2175 }
 0xb53   :  { %v1144_v14 = vsel %vm219_vm9, %v1139_v13, 0  ;;  %v1438_v21 = vsel %vm179_vm8, %v2176_v20, 0.0 }
 0xb54   :  { %v1021_v17 = vpack.c.bf16 %v1020_v12, %v1020_v12  ;;  %1153 = vmatpush.bf16.msra.mxu1 %v1144_v14 }
 0xb56   :  { %1926 = vmatmul.msk.bf16.vlgmr.msrb.gmra.mxu1 %vm179_vm8, %v1021_v17 }
 0xb5a   :  { %v1329_v22 = vpop.permute.xlu2 %1328 }
 0xb5b   :  { %v1334_v28 = vsel %vm219_vm9, %v1329_v22, 0 }
 0xb69   :  { %v1076_v23 = vpop.xlane.xlu0 %1075  ;;  %1439 = vadd.xlane.f32.xlu2 %v1438_v21 }
 0xb6a   :  { %2177 = vrcp.f32 %v1076_v23 }
 0xb70   :  { %v2178_v27 = vpop.eup %2177 }
 0xb71   :  { %v1078_v24 = vmul.f32 %v2178_v27, %v2702_v40 }
 0xb73   :  { %v1079_v25 = vpack.c.bf16 %v1078_v24, %v1078_v24 }
 0xb75   :  { %1928 = vmatmul.msk.bf16.vlgmr.msra.gmra.mxu2 %vm179_vm8, %v1079_v25 }
 0xb7c   :  { %v1197_v26 = vpop.permute.xlu0 %1196 }
 0xb7d   :  { %v1202_v49 = vsel %vm219_vm9, %v1197_v26, 0 }
 0xb7e   :  { %1211 = vmatpush.bf16.msrb.mxu2 %v1202_v49 }
 0xb81   :  { %v1266_v32 = vpop.xlane.xlu1 %1265 }
 0xb82   :  { %1343 = vmatpush.bf16.msra.mxu2 %v1334_v28 }
 0xb93   :  { %v1134_v29 = vpop.xlane.xlu2 %1133 }
 0xb94   :  { %2179 = vrcp.f32 %v1134_v29 }
 0xb99   :  { %v1445_v37 = vpop.permute.xlu1 %1444 }
 0xb9a   :  { %v2180_v50 = vpop.eup %2179  ;;  %v1450_v40 = vsel %vm219_vm9, %v1445_v37, 0 }
 0xb9b   :  { %v1136_v30 = vmul.f32 %v2180_v50, %v2166_v58  ;;  %v1192_v31 = vpop.xlane.xlu2 %1191 }
 0xb9c   :  { %2181 = vrcp.f32 %v1192_v31 }
 0xb9d   :  { %v1137_v33 = vpack.c.bf16 %v1136_v30, %v1136_v30  ;;  %2183 = vrcp.f32 %v1266_v32 }
 0xb9f   :  { %1930 = vmatmul.msk.bf16.vlgmr.msra.gmra.mxu1 %vm179_vm8, %v1137_v33 }
 0xba2   :  { %v2182_v34 = vpop.eup %2181 }
 0xba3   :  { %v1194_v35 = vmul.f32 %v2182_v34, %v2168_v63  ;;  %v1271_v36 = vpop.permute.xlu2 %1270  ;;  %v2184_v48 = vpop.eup %2183  ;;  %v2100_v34 = vld [vmem:[%s2854_s5 + $0x1] ss:$0 sm:$0xff] }
 0xba4   :  { %v1276_v38 = vsel %vm219_vm9, %v1271_v36, 0  ;;  %v1268_v43 = vmul.f32 %v2184_v48, %v2710_v47 }
 0xba5   :  { %v1195_v39 = vpack.c.bf16 %v1194_v35, %v1194_v35  ;;  %1285 = vmatpush.bf16.msrb.mxu1 %v1276_v38 }
 0xba6   :  { %v1269_v41 = vpack.c.bf16 %v1268_v43, %v1268_v43 }
 0xba7   :  { %v1324_v42 = vpop.xlane.xlu0 %1323  ;;  %1932 = vmatmul.msk.bf16.vlgmr.msrb.gmra.mxu2 %vm179_vm8, %v1195_v39 }
 0xba8   :  { %2185 = vrcp.f32 %v1324_v42  ;;  %1459 = vmatpush.bf16.msrb.mxu2 %v1450_v40 }
 0xbae   :  { %v2186_v44 = vpop.eup %2185 }
 0xbaf   :  { %1934 = vmatmul.msk.bf16.vlgmr.msrb.gmra.mxu1 %vm179_vm8, %v1269_v41  ;;  %v1326_v45 = vmul.f32 %v2186_v44, %v2719_v5  ;;  %v1382_v51 = vpop.xlane.xlu0 %1381 }
 0xbb0   :  { %2187 = vrcp.f32 %v1382_v51 }
 0xbb1   :  { %v1327_v46 = vpack.c.bf16 %v1326_v45, %v1326_v45 }
 0xbb6   :  { %v2188_v52 = vpop.eup %2187 }
 0xbb7   :  { %1936 = vmatmul.msk.bf16.vlgmr.msra.gmra.mxu2 %vm179_vm8, %v1327_v46  ;;  %v1384_v53 = vmul.f32 %v2188_v52, %v2723_v6 }
 0xbb9   :  { %v1385_v56 = vpack.c.bf16 %v1384_v53, %v1384_v53 }
 0xbc2   :  { %v1387_v54 = vpop.permute.xlu0 %1386 }
 0xbc3   :  { %v1392_v55 = vsel %vm219_vm9, %v1387_v54, 0 }
 0xbc4   :  { %1401 = vmatpush.bf16.msra.mxu1 %v1392_v55 }
 0xbc7   :  { %1938 = vmatmul.msk.bf16.vlgmr.msra.gmra.mxu1 %vm179_vm8, %v1385_v56 }
 0xbd3   :  { %v1039_v47 = vpop.f32.mrf.mxu1 }
 0xbdb   :  { %v1041_v58 = vpop.f32.mrf.mxu1 }
 0xbdc   :  { %v1440_v59 = vpop.xlane.xlu2 %1439  ;;  %v2031_v58 = vld [vmem:[%s2857_s8 + $0x10] sm:$0xff] }
 0xbdd   :  { %2189 = vrcp.f32 %v1440_v59 }
 0xbe3   :  { %v2190_v60 = vpop.eup %2189 }
 0xbe4   :  { %v1442_v57 = vmul.f32 %v2190_v60, %v2176_v20 }
 0xbe6   :  { %v1443_v61 = vpack.c.bf16 %v1442_v57, %v1442_v57 }
 0xbe8   :  { %1940 = vmatmul.msk.bf16.vlgmr.msrb.gmra.mxu2 %vm179_vm8, %v1443_v61 }
 0xbf8   :  { %v1097_v63 = vpop.f32.mrf.mxu2 }
 0xc00   :  { %v1099_v0 = vpop.f32.mrf.mxu2 }
 0xc1c   :  { %v1155_v1 = vpop.f32.mrf.mxu1 }
 0xc24   :  { %v1157_v2 = vpop.f32.mrf.mxu1 }
 0xc2a   :  { %v1213_v3 = vpop.f32.mrf.mxu2 }
 0xc2c   :  { %v1287_v4 = vpop.f32.mrf.mxu1 }
 0xc32   :  { %v1215_v5 = vpop.f32.mrf.mxu2 }
 0xc34   :  { %v1289_v62 = vpop.f32.mrf.mxu1 }
 0xc3a   :  { %v1345_v6 = vpop.f32.mrf.mxu2 }
 0xc3b   :  { %v2072_v7 = vpack.i.bf16 %v1345_v6, %v1097_v63 }
 0xc3d   :  { %2073 = vrot.lane.b32.xlu1 %v2072_v7, %s2909_s30 }
 0xc42   :  { %v1347_v8 = vpop.f32.mrf.mxu2 }
 0xc44   :  { %v1403_v9 = vpop.f32.mrf.mxu1 }
 0xc45   :  { %v2077_v11 = vpack.i.bf16 %v1403_v9, %v1155_v1  ;;  %v2101_v9 = vld [vmem:[%s2855_s6 + $0x1] ss:$0 sm:$0xff]  ;;  %s1840_s6 = sshll.u32 %s2246_s25, 4  ;;  %s1841_s6 = int_to_ptr.vmem [resolvable:$true] %s1840_s6 }
 0xc47   :  { %2078 = vrot.lane.b32.xlu0 %v2077_v11, %s2910_s4  ;;  %s1842_s4 = sshll.u32 %s2869_s20, 4  ;;  %s1843_s4 = int_to_ptr.hbm [resolvable:$true] %s1842_s4 }
 0xc4c   :  { %v1405_v12 = vpop.f32.mrf.mxu1 }
 0xc6b   :  { %v1461_v13 = vpop.f32.mrf.mxu2 }
 0xc6c   :  { %v2082_v14 = vpack.i.bf16 %v1461_v13, %v1213_v3 }
 0xc6e   :  { %2083 = vrot.lane.b32.xlu2 %v2082_v14, %s2911_s0  ;;  %v2102_v14 = vld [vmem:[%s2856_s7 + $0x1] ss:$0 sm:$0xff] }
 0xc73   :  { %v1463_v17 = vpop.f32.mrf.mxu2 }
 0xcaf   :  { %v2074_v20 = vpop.permute.xlu1 %2073 }
 0xcb0   :  { %v2076_v23 = vunpack.i.h.bf16 %v2074_v20  ;;  %v2075_v27 = vunpack.i.l.bf16 %v2074_v20 }
 0xcb2   :  { %v1477_v26 = vsel %vm179_vm8, %v1287_v4, %v2076_v23  ;;  %v1229_v49 = vsel %vm179_vm8, %v1039_v47, %v2075_v27  ;;  %v2036_v27 = vld [vmem:[%s2859_s10 + $0x38] sm:$0xff] }
 0xcb3   :  { %1684 = vmatpush.bf16.msrb.mxu3 %v2036_v27 }
 0xcb9   :  { %v2079_v21 = vpop.permute.xlu0 %2078 }
 0xcba   :  { %v2081_v24 = vunpack.i.h.bf16 %v2079_v21  ;;  %v2080_v25 = vunpack.i.l.bf16 %v2079_v21 }
 0xcbc   :  { %v1230_v50 = vsel %vm423_vm10, %v1229_v49, %v2080_v25  ;;  %v1478_v30 = vsel %vm423_vm10, %v1477_v26, %v2081_v24  ;;  %v2035_v24 = vld [vmem:[%s2859_s10 + $0x30] sm:$0xff]  ;;  %v2034_v25 = vld [vmem:[%s2859_s10 + $0x28] sm:$0xff]  ;;  %v2033_v49 = vld [vmem:[%s2859_s10 + $0x20] sm:$0xff] }
 0xcbd   :  { %1685 = vmatpush.bf16.msrb.mxu3 %v2035_v24 }
 0xcc1   :  { %1686 = vmatpush.bf16.msrb.mxu3 %v2034_v25 }
 0xcc5   :  { %1687 = vmatpush.bf16.msrb.mxu3 %v2033_v49 }
 0xcc8   :  { %v2084_v22 = vpop.permute.xlu2 %2083 }
 0xcc9   :  { %v2086_v28 = vunpack.i.h.bf16 %v2084_v22  ;;  %v2085_v29 = vunpack.i.l.bf16 %v2084_v22  ;;  %v2103_v22 = vld [vmem:[%s2858_s9 + $0x1] ss:$0 sm:$0xff] }
 0xccb   :  { %v1231_v31 = vsel %vm425_vm11, %v1230_v50, %v2085_v29  ;;  %v1479_v32 = vsel %vm425_vm11, %v1478_v30, %v2086_v28 }
 0xccc   :  { %v1485_v33 = vpack.c.bf16 %v1479_v32, %v1231_v31 }
 0xcce   :  { %1954 = vmatmul.msk.bf16.vlgmr.msrb.gmra.mxu0 %vm71_vm0, %v1485_v33 }
 0xd4b   :  { %v1515_v35 = vpop.f32.mrf.mxu0 }
 0xd4c   :  { %v1516_v36 = vadd.f32 %v2100_v34, %v1515_v35 }
 0xd4e   :  { %v1520_v37 = vadd.f32 %v1516_v36, %v2617_v15 }
 0xd50   :  { %v1526_v38 = vsel %vm71_vm0, %v1520_v37, 0.0 }
 0xd51   :  { %1527 = vadd.xlane.f32.xlu1 %v1526_v38 }
 0xd53   :  { %v1517_v39 = vpop.f32.mrf.mxu0 }
 0xd54   :  { %v1518_v48 = vadd.f32 %v2100_v34, %v1517_v39 }
 0xd56   :  { %v1521_v40 = vadd.f32 %v1518_v48, %v2619_v16  ;;  %v2032_v16 = vld [vmem:[%s2857_s8 + $0x18] sm:$0xff] }
 0xd57   :  { %1612 = vmatpush.bf16.msrb.mxu1 %v2032_v16 }
 0xd58   :  { %v1529_v42 = vsel %vm71_vm0, %v1521_v40, 0.0 }
 0xd59   :  { %1530 = vadd.xlane.f32.xlu0 %v1529_v42 }
 0xd5b   :  { %1613 = vmatpush.bf16.msrb.mxu1 %v2031_v58 }
 0xdc4   :  { %v1528_v43 = vpop.xlane.xlu1 %1527 }
 0xdc5   :  { %v1532_v41 = vmul.f32 %v1528_v43, %v2360_v10 }
 0xdc7   :  { %v1534_v44 = vsub.f32 %v1520_v37, %v1532_v41 }
 0xdc9   :  { %v1536_v45 = vmul.f32 %v1534_v44, %v1534_v44 }
 0xdcb   :  { %v1538_v46 = vsel %vm71_vm0, %v1536_v45, 0.0 }
 0xdcc   :  { %v1531_v51 = vpop.xlane.xlu0 %1530  ;;  %1539 = vadd.xlane.f32.xlu2 %v1538_v46 }
 0xdcd   :  { %v1533_v15 = vmul.f32 %v1531_v51, %v2360_v10 }
 0xdcf   :  { %v1535_v52 = vsub.f32 %v1521_v40, %v1533_v15  ;;  %v2104_v15 = vld [vmem:[%s2860_s11 + $0x1] ss:$0 sm:$0xff] }
 0xdd1   :  { %v1537_v53 = vmul.f32 %v1535_v52, %v1535_v52 }
 0xdd3   :  { %v1541_v54 = vsel %vm71_vm0, %v1537_v53, 0.0 }
 0xdd4   :  { %1542 = vadd.xlane.f32.xlu1 %v1541_v54 }
 0xe3f   :  { %v1540_v55 = vpop.xlane.xlu2 %1539 }
 0xe40   :  { %v1544_v56 = vmul.f32 %v1540_v55, %v2360_v10 }
 0xe42   :  { %v1546_v47 = vadd.f32 1e-12, %v1544_v56 }
 0xe44   :  { %2191 = vrsqrt.f32 %v1546_v47  ;;  %vm1554_vm9 = vweird.f32 %v1546_v47 }
 0xe47   :  { %v1543_v59 = vpop.xlane.xlu1 %1542 }
 0xe48   :  { %v1545_v60 = vmul.f32 %v1543_v59, %v2360_v10 }
 0xe4a   :  { %v2192_v57 = vpop.eup %2191  ;;  %v1547_v61 = vadd.f32 1e-12, %v1545_v60 }
 0xe4b   :  { %v1549_v63 = vmul.f32 %v2192_v57, %v1546_v47  ;;  %vm1555_vm8 = vweird.f32 %v2192_v57 }
 0xe4c   :  { %2193 = vrsqrt.f32 %v1547_v61  ;;  %vm1556_vm10 = vmor %vm1554_vm9, %vm1555_vm8  ;;  %vm1564_vm14 = vweird.f32 %v1547_v61 }
 0xe4d   :  { %v1550_v0 = vmul.f32 %v2192_v57, %v1549_v63 }
 0xe4f   :  { %v1551_v1 = vmul.f32 0.5, %v1550_v0 }
 0xe51   :  { %v1552_v2 = vsub.f32 1.5, %v1551_v1 }
 0xe52   :  { %v2194_v3 = vpop.eup %2193 }
 0xe53   :  { %v1553_v4 = vmul.f32 %v2192_v57, %v1552_v2  ;;  %v1559_v5 = vmul.f32 %v2194_v3, %v1547_v61  ;;  %vm1565_vm11 = vweird.f32 %v2194_v3 }
 0xe54   :  { %vm1566_vm15 = vmor %vm1564_vm14, %vm1565_vm11 }
 0xe55   :  { %v1560_v62 = vmul.f32 %v2194_v3, %v1559_v5  ;;  %v1557_v6 = vsel %vm1556_vm10, %v2192_v57, %v1553_v4 }
 0xe56   :  { %v1568_v11 = vmul.f32 %v1557_v6, %v1534_v44  ;;  %v2038_v6 = vld [vmem:[%s2865_s16 + $0x8] sm:$0xff] }
 0xe57   :  { %v1561_v7 = vmul.f32 0.5, %v1560_v62  ;;  %1789 = vmatpush.bf16.msra.mxu2 %v2038_v6 }
 0xe58   :  { %v1573_v17 = vmul.f32 %v2101_v9, %v1568_v11 }
 0xe59   :  { %v1562_v8 = vsub.f32 1.5, %v1561_v7 }
 0xe5a   :  { %v1578_v20 = vadd.f32 %v2102_v14, %v1573_v17 }
 0xe5b   :  { %v1563_v12 = vmul.f32 %v2194_v3, %v1562_v8  ;;  %v2037_v8 = vld [vmem:[%s2865_s16] sm:$0xff] }
 0xe5c   :  { %1790 = vmatpush.bf16.msra.mxu2 %v2037_v8 }
 0xe5d   :  { %v1567_v13 = vsel %vm1566_vm15, %v2194_v3, %v1563_v12 }
 0xe5e   :  { %v1569_v18 = vmul.f32 %v1567_v13, %v1535_v52 }
 0xe60   :  { %v1574_v19 = vmul.f32 %v2101_v9, %v1569_v18 }
 0xe62   :  { %v1579_v21 = vadd.f32 %v2102_v14, %v1574_v19 }
 0xe64   :  { %v1585_v23 = vpack.c.bf16 %v1579_v21, %v1578_v20 }
 0xe66   :  { %1970 = vmatmul.msk.bf16.vlgmr.msrb.gmra.mxu1 %vm71_vm0, %v1585_v23 }
 0xee3   :  { %v1615_v26 = vpop.f32.mrf.mxu1 }
 0xee4   :  { %v1616_v28 = vadd.f32 %v2103_v22, %v1615_v26 }
 0xee6   :  { %v1620_v29 = vmul.f32 %v1616_v28, %v1616_v28 }
 0xee8   :  { %v1622_v50 = vmul.f32 %v1620_v29, %v1616_v28 }
 0xeea   :  { %v1624_v30 = vmul.f32 0.044715, %v1622_v50  ;;  %v2106_v50 = vld [vmem:[%s2862_s13 + $0x1] ss:$0 sm:$0xff] }
 0xeeb   :  { %v1617_v31 = vpop.f32.mrf.mxu1 }
 0xeec   :  { %v1626_v32 = vadd.f32 %v1624_v30, %v1616_v28  ;;  %v1618_v33 = vadd.f32 %v2103_v22, %v1617_v31 }
 0xeee   :  { %v1628_v34 = vmul.f32 0.7978846, %v1626_v32  ;;  %v1621_v35 = vmul.f32 %v1618_v33, %v1618_v33 }
 0xef0   :  { %v1623_v36 = vmul.f32 %v1621_v35, %v1618_v33  ;;  %2195 = vtanh.f32 %v1628_v34 }
 0xef2   :  { %v1625_v37 = vmul.f32 0.044715, %v1623_v36 }
 0xef4   :  { %v1627_v38 = vadd.f32 %v1625_v37, %v1618_v33  ;;  %v2040_v37 = vld [vmem:[%s2867_s18 + $0x8] sm:$0xff] }
 0xef5   :  { %1827 = vmatpush.bf16.msra.mxu0 %v2040_v37 }
 0xef6   :  { %v1629_v39 = vmul.f32 0.7978846, %v1627_v38  ;;  %v2196_v48 = vpop.eup %2195  ;;  %v2039_v38 = vld [vmem:[%s2867_s18] sm:$0xff] }
 0xef7   :  { %v1632_v40 = vadd.f32 1.0, %v2196_v48 }
 0xef8   :  { %2197 = vtanh.f32 %v1629_v39  ;;  %v2107_v39 = vld [vmem:[%s2866_s17] ss:$0 sm:$0xff] }
 0xef9   :  { %v1634_v43 = vmul.f32 0.5, %v1632_v40  ;;  %1828 = vmatpush.bf16.msra.mxu0 %v2039_v38 }
 0xefb   :  { %v1636_v45 = vmul.f32 %v1634_v43, %v1616_v28 }
 0xefe   :  { %v2198_v42 = vpop.eup %2197 }
 0xeff   :  { %v1633_v41 = vadd.f32 1.0, %v2198_v42 }
 0xf01   :  { %v1635_v44 = vmul.f32 0.5, %v1633_v41 }
 0xf03   :  { %v1637_v46 = vmul.f32 %v1635_v44, %v1618_v33  ;;  %v2108_v44 = vld [vmem:[%s2868_s19] ss:$0 sm:$0xff] }
 0xf05   :  { %v1647_v51 = vpack.c.bf16 %v1637_v46, %v1636_v45 }
 0xf07   :  { %1996 = vmatmul.msk.bf16.vlgmr.msrb.gmra.mxu3 %vm866_vm3, %v1647_v51 }
 0xf8a   :  { %v1689_v52 = vpop.f32.mrf.mxu3 }
 0xf8b   :  { %v1690_v53 = vadd.f32 %v2104_v15, %v1689_v52 }
 0xf8d   :  { %v1694_v54 = vadd.f32 %v1690_v53, %v1578_v20 }
 0xf8f   :  { %v1700_v16 = vsel %vm71_vm0, %v1694_v54, 0.0 }
 0xf90   :  { %1701 = vadd.xlane.f32.xlu1 %v1700_v16 }
 0xf92   :  { %v1691_v55 = vpop.f32.mrf.mxu3 }
 0xf93   :  { %v1692_v56 = vadd.f32 %v2104_v15, %v1691_v55 }
 0xf95   :  { %v1695_v47 = vadd.f32 %v1692_v56, %v1579_v21 }
 0xf97   :  { %v1703_v58 = vsel %vm71_vm0, %v1695_v47, 0.0 }
 0xf98   :  { %1704 = vadd.xlane.f32.xlu0 %v1703_v58 }
0x1003   :  { %v1702_v59 = vpop.xlane.xlu1 %1701 }
0x1004   :  { %v1706_v60 = vmul.f32 %v1702_v59, %v2360_v10 }
0x1006   :  { %v1708_v57 = vsub.f32 %v1694_v54, %v1706_v60 }
0x1008   :  { %v1710_v61 = vmul.f32 %v1708_v57, %v1708_v57 }
0x100a   :  { %v1712_v63 = vsel %vm71_vm0, %v1710_v61, 0.0 }
0x100b   :  { %v1705_v0 = vpop.xlane.xlu0 %1704  ;;  %1713 = vadd.xlane.f32.xlu1 %v1712_v63 }
0x100c   :  { %v1707_v1 = vmul.f32 %v1705_v0, %v2360_v10 }
0x100e   :  { %v1709_v2 = vsub.f32 %v1695_v47, %v1707_v1 }
0x1010   :  { %v1711_v3 = vmul.f32 %v1709_v2, %v1709_v2 }
0x1012   :  { %v1715_v4 = vsel %vm71_vm0, %v1711_v3, 0.0 }
0x1013   :  { %1716 = vadd.xlane.f32.xlu0 %v1715_v4 }
0x107e   :  { %v1714_v5 = vpop.xlane.xlu1 %1713 }
0x107f   :  { %v1718_v62 = vmul.f32 %v1714_v5, %v2360_v10 }
0x1081   :  { %v1720_v7 = vadd.f32 1e-12, %v1718_v62 }
0x1083   :  { %2199 = vrsqrt.f32 %v1720_v7  ;;  %vm1728_vm2 = vweird.f32 %v1720_v7 }
0x1086   :  { %v1717_v9 = vpop.xlane.xlu0 %1716 }
0x1087   :  { %v1719_v11 = vmul.f32 %v1717_v9, %v2360_v10  ;;  %v2105_v10 = vld [vmem:[%s2861_s12 + $0x1] ss:$0 sm:$0xff] }
0x1089   :  { %v2200_v12 = vpop.eup %2199  ;;  %v1721_v13 = vadd.f32 1e-12, %v1719_v11 }
0x108a   :  { %v1723_v14 = vmul.f32 %v2200_v12, %v1720_v7  ;;  %vm1729_vm1 = vweird.f32 %v2200_v12 }
0x108b   :  { %2201 = vrsqrt.f32 %v1721_v13  ;;  %vm1730_vm3 = vmor %vm1728_vm2, %vm1729_vm1  ;;  %vm1738_vm5 = vweird.f32 %v1721_v13 }
0x108c   :  { %v1724_v17 = vmul.f32 %v2200_v12, %v1723_v14 }
0x108e   :  { %v1725_v18 = vmul.f32 0.5, %v1724_v17 }
0x1090   :  { %v1726_v19 = vsub.f32 1.5, %v1725_v18 }
0x1091   :  { %v2202_v20 = vpop.eup %2201 }
0x1092   :  { %v1733_v21 = vmul.f32 %v2202_v20, %v1721_v13  ;;  %v1727_v23 = vmul.f32 %v2200_v12, %v1726_v19  ;;  %vm1739_vm4 = vweird.f32 %v2202_v20 }
0x1093   :  { %vm1740_vm6 = vmor %vm1738_vm5, %vm1739_vm4 }
0x1094   :  { %v1734_v27 = vmul.f32 %v2202_v20, %v1733_v21  ;;  %v1731_v25 = vsel %vm1730_vm3, %v2200_v12, %v1727_v23 }
0x1095   :  { %v1742_v49 = vmul.f32 %v1731_v25, %v1708_v57 }
0x1096   :  { %v1735_v24 = vmul.f32 0.5, %v1734_v27 }
0x1097   :  { %v1747_v30 = vmul.f32 %v2105_v10, %v1742_v49 }
0x1098   :  { %v1736_v22 = vsub.f32 1.5, %v1735_v24 }
0x1099   :  { %v1752_v33 = vadd.f32 %v2106_v50, %v1747_v30 }
0x109a   :  { %v1737_v26 = vmul.f32 %v2202_v20, %v1736_v22 }
0x109c   :  { %v1741_v28 = vsel %vm1740_vm6, %v2202_v20, %v1737_v26 }
0x109d   :  { %v1743_v29 = vmul.f32 %v1741_v28, %v1709_v2 }
0x109f   :  { %v1748_v31 = vmul.f32 %v2105_v10, %v1743_v29 }
0x10a1   :  { %v1753_v32 = vadd.f32 %v2106_v50, %v1748_v31 }
0x10a3   :  { %v1755_v34 = vrot.slane %v1753_v32, 7 }
0x10a5   :  { %v1758_v35 = vsel %vm1757_vm7, %v1752_v33, %v1755_v34 }
0x10a6   :  { %v1763_v36 = vpack.c.bf16 %v1758_v35, %v1758_v35 }
0x10a8   :  { %2007 = vmatmul.msk.bf16.vlgmr.msra.gmra.mxu2 %vm71_vm0, %v1763_v36 }
0x112b   :  { %v1792_v48 = vpop.f32.mrf.mxu2 }
0x112c   :  { %v1793_v40 = vadd.f32 %v2107_v39, %v1792_v48 }
0x112e   :  { %2203 = vtanh.f32 %v1793_v40 }
0x1133   :  { %v1794_v42 = vpop.f32.mrf.mxu2 }
0x1134   :  { %v2204_v43 = vpop.eup %2203 }
0x1135   :  { %v1801_v41 = vpack.c.bf16 %v2204_v43, %v2204_v43 }
0x1137   :  { %2016 = vmatmul.msk.bf16.vlgmr.msra.gmra.mxu0 %vm71_vm0, %v1801_v41 }
0x11b4   :  { %v1830_v45 = vpop.f32.mrf.mxu0 }
0x11b5   :  { %v1831_v46 = vadd.f32 %v2108_v44, %v1830_v45 }
0x11b7   :  { %1834 = vst [vmem:[#allocation2] sm:$0x3] %v1831_v46 }
0x11b8   :  { %1845 = dma.vmem_to_hbm [thread:$0]  %s1841_s6, 32, %s1843_s4, [#allocation3]  }
0x11bc   :  { %v1832_v51 = vpop.f32.mrf.mxu0 }
0x11bd   :  { %2229 = dma.done.wait [#allocation3], 32  }
0x11be   :  { %2230 = vsyncadd [#allocation3], 4294967264 }
0x11bf   :  { %1850 = vsyncpa [#allocation3], 1 }

</bundles_post_ra>
